<compile_context>
chip_gen: v7x
topology: tpu7x:2x2x1
jax: 0.10.0
libtpu: 0.0.40
codegen_flags: <defaults>
</compile_context>

<pallas_src>
import numpy as np
import jax
import jax.numpy as jnp
from jax import lax
from jax.experimental import pallas as pl
from jax.experimental.pallas import tpu as pltpu

KSIZE = 6      # self.kernel
M = 30         # self.m  (feature width, also output size)
CNN_HID = 100  # self.CNNhid
RNN_HID = 100  # self.RNNhid

CPAD = 128     # CNN hidden / GRU input width padded to one full lane tile
GP = 128       # per-gate (and hidden) width padded to one full lane tile


def _cdiv(a, b):
    return (a + b - 1) // b


def _round_up(a, b):
    return _cdiv(a, b) * b


def _make_kernel(bt, ch, s_total, split):
    """Build the per-(batch-tile, S-chunk) kernel with static shapes baked in."""

    def gru_cell(gi, gh, h):
        # PyTorch GRU gate order r, z, n; each gate lane-aligned at 128.
        r = jax.nn.sigmoid(gi[:, 0:GP] + gh[:, 0:GP])
        z = jax.nn.sigmoid(gi[:, GP:2 * GP] + gh[:, GP:2 * GP])
        n = jnp.tanh(gi[:, 2 * GP:3 * GP] + r * gh[:, 2 * GP:3 * GP])
        return (1.0 - z) * n + z * h

    def kernel(x_ref,                   # ((ch+K-1)*bt, M)  rows: u*bt + b_local
               wc_ref, bc_ref,          # (K, M, CPAD), (1, CPAD)
               wih_ref, bih_ref,        # (CPAD, 3*GP), (1, 3*GP)
               whh_ref, bhh_ref,        # (GP, 3*GP),   (1, 3*GP)
               wout_ref, bout_ref,      # (GP, GP),     (1, GP)
               out_ref,                 # (bt, GP)
               gi_ref,                  # VMEM scratch (ch*bt, 3*GP)
               h_ref):                  # VMEM scratch (bt, GP), carried across chunks
        c = pl.program_id(1)

        @pl.when(c == 0)
        def _():
            h_ref[...] = jnp.zeros_like(h_ref)

        # ---- conv as K shifted matmuls over this S-chunk --------------------
        acc = jnp.dot(x_ref[0:ch * bt, :], wc_ref[0],
                      preferred_element_type=jnp.float32)
        for k in range(1, KSIZE):                            # static, unrolled
            acc = acc + jnp.dot(x_ref[k * bt:k * bt + ch * bt, :], wc_ref[k],
                                preferred_element_type=jnp.float32)
        feat = jnp.tanh(acc + bc_ref[...])     # dropout == identity (eval mode)

        # ---- GRU input projection for the whole chunk (one big matmul) ------
        gi_ref[...] = (jnp.dot(feat, wih_ref[...],
                               preferred_element_type=jnp.float32)
                       + bih_ref[...])                       # (ch*bt, 3*GP)

        base = c * ch                                        # global step offset
        unroll = min(ch, 8)

        # ---- recurrence: only h @ Whh + gate math on the critical path ------
        # (Padded steps past s_total in the last chunk are masked out.)
        if split:
            half = bt // 2
            bhh_h = jnp.broadcast_to(bhh_ref[...], (half, 3 * GP))  # hoisted

            def step(s, carry):
                ha, hb = carry
                start = pl.multiple_of(s * bt, 8)
                gia = gi_ref[pl.ds(start, half), :]
                gib = gi_ref[pl.ds(start + half, half), :]
                # two independent chains -> MXU drain overlaps EUP/VPU work
                gha = jnp.dot(ha, whh_ref[...],
                              preferred_element_type=jnp.float32) + bhh_h
                ghb = jnp.dot(hb, whh_ref[...],
                              preferred_element_type=jnp.float32) + bhh_h
                ha_n = gru_cell(gia, gha, ha)
                hb_n = gru_cell(gib, ghb, hb)
                valid = (base + s) < s_total
                return (jnp.where(valid, ha_n, ha),
                        jnp.where(valid, hb_n, hb))

            ha, hb = lax.fori_loop(
                0, ch, step,
                (h_ref[pl.ds(0, half), :], h_ref[pl.ds(half, half), :]),
                unroll=unroll)
            h_ref[pl.ds(0, half), :] = ha
            h_ref[pl.ds(half, half), :] = hb
            out_ref[pl.ds(0, half), :] = (
                jnp.dot(ha, wout_ref[...], preferred_element_type=jnp.float32)
                + bout_ref[...])
            out_ref[pl.ds(half, half), :] = (
                jnp.dot(hb, wout_ref[...], preferred_element_type=jnp.float32)
                + bout_ref[...])
        else:
            bhh_f = jnp.broadcast_to(bhh_ref[...], (bt, 3 * GP))   # hoisted

            def step(s, h):
                start = pl.multiple_of(s * bt, 8)
                gi = gi_ref[pl.ds(start, bt), :]
                gh = jnp.dot(h, whh_ref[...],
                             preferred_element_type=jnp.float32) + bhh_f
                h_n = gru_cell(gi, gh, h)
                valid = (base + s) < s_total
                return jnp.where(valid, h_n, h)

            h = lax.fori_loop(0, ch, step, h_ref[...], unroll=unroll)
            h_ref[...] = h
            out_ref[...] = (jnp.dot(h, wout_ref[...],
                                    preferred_element_type=jnp.float32)
                            + bout_ref[...])

    return kernel


def _prep_params(params):
    """Reshape / lane-pad PyTorch-layout parameters (plain JAX glue)."""
    H = RNN_HID

    # Conv2d(1, 100, (6, 30)) weight (C,1,K,M) -> per-offset (K, M, CPAD)
    wc = params["conv_w"].reshape(CNN_HID, KSIZE, M).transpose(1, 2, 0)  # (K, M, C)
    wc = jnp.pad(wc, ((0, 0), (0, 0), (0, CPAD - CNN_HID)))
    bc = jnp.pad(params["conv_b"], (0, CPAD - CNN_HID)).reshape(1, CPAD)

    def gate_pack(w, in_dim, in_pad):
        # torch (3H, in) with gates r,z,n stacked -> (in_pad, 3*GP), gate g at
        # lanes [GP*g, GP*g + H), zero padding elsewhere.
        wg = w.reshape(3, H, in_dim)
        cols = []
        for g in range(3):
            blk = wg[g].T                                    # (in, H)
            blk = jnp.pad(blk, ((0, in_pad - in_dim), (0, GP - H)))
            cols.append(blk)
        return jnp.concatenate(cols, axis=1)                 # (in_pad, 3*GP)

    def bias_pack(b):
        bg = jnp.pad(b.reshape(3, H), ((0, 0), (0, GP - H)))
        return bg.reshape(1, 3 * GP)

    wih = gate_pack(params["gru_w_ih"], CNN_HID, CPAD)       # (CPAD, 3*GP)
    whh = gate_pack(params["gru_w_hh"], H, GP)               # (GP, 3*GP)
    bih = bias_pack(params["gru_b_ih"])
    bhh = bias_pack(params["gru_b_hh"])

    wout = jnp.pad(params["out_w"].T, ((0, GP - H), (0, GP - M)))  # (GP, GP)
    bout = jnp.pad(params["out_b"], (0, GP - M)).reshape(1, GP)
    return wc, bc, wih, bih, whh, bhh, wout, bout


def network_forward(x, params):
    B, T, m = x.shape
    assert m == M and T >= KSIZE
    S = T - KSIZE + 1
    x = x.astype(jnp.float32)

    # ---- batch tiling: bt always a multiple of 8; >=2 tiles for megacore ----
    B8 = _round_up(B, 8)
    if B8 <= 8:
        bt = B8
    else:
        bt = min(256, _round_up(_cdiv(B8, 2), 8))
    nb = _cdiv(B8, bt)
    Bp = nb * bt

    # ---- S-chunking: chunk-dependent VMEM bounded (~24 MiB), indep. of T ----
    # bytes per (step * bt-row): gi 1536 + conv acc/feat 1024 + x dbl-buf 1024
    ch_budget = max(8, min(128, ((24 << 20) // (3584 * bt)) // 8 * 8))
    n_chunks = _cdiv(S, ch_budget)
    ch = _round_up(_cdiv(S, n_chunks), 8)        # balanced chunks, multiple of 8
    S_pad = n_chunks * ch
    T_pad = S_pad + KSIZE - 1

    xp = jnp.pad(x, ((0, Bp - B), (0, T_pad - T), (0, 0)))
    # per batch tile: time-major rows (row = t*bt + b_local)
    x5 = xp.reshape(nb, bt, T_pad, M).transpose(0, 2, 1, 3)       # (nb, T_pad, bt, M)
    idx = np.arange(n_chunks)[:, None] * ch + np.arange(ch + KSIZE - 1)[None, :]
    x_chunks = x5[:, idx]                               # (nb, n_chunks, ch+K-1, bt, M)
    x_chunks = x_chunks.reshape(nb, n_chunks, (ch + KSIZE - 1) * bt, M)

    wc, bc, wih, bih, whh, bhh, wout, bout = _prep_params(params)

    split = (bt >= 16) and (bt % 16 == 0)
    kernel = _make_kernel(bt, ch, S, split)

    def full_spec(a):
        nd = a.ndim
        return pl.BlockSpec(a.shape, lambda i, c, nd=nd: (0,) * nd)

    # ---- explicit per-shape VMEM budget (x chunk lane-pads 30 -> 128) -------
    xbytes = 2 * (ch + KSIZE - 1) * bt * 128 * 4     # double-buffered x chunk
    gibytes = ch * bt * 3 * GP * 4                   # gi scratch
    tmpbytes = 2 * ch * bt * CPAD * 4                # conv acc + feat temporaries
    vmem_limit = int(min(max(xbytes + gibytes + tmpbytes + (4 << 20), 16 << 20),
                         48 << 20))

    out = pl.pallas_call(
        kernel,
        out_shape=jax.ShapeDtypeStruct((nb, bt, GP), jnp.float32),
        grid=(nb, n_chunks),
        in_specs=[pl.BlockSpec((None, None, (ch + KSIZE - 1) * bt, M),
                               lambda i, c: (i, c, 0, 0)),
                  full_spec(wc), full_spec(bc),
                  full_spec(wih), full_spec(bih),
                  full_spec(whh), full_spec(bhh),
                  full_spec(wout), full_spec(bout)],
        out_specs=pl.BlockSpec((None, bt, GP), lambda i, c: (i, 0, 0)),
        scratch_shapes=[pltpu.VMEM((ch * bt, 3 * GP), jnp.float32),
                        pltpu.VMEM((bt, GP), jnp.float32)],
        compiler_params=pltpu.CompilerParams(
            dimension_semantics=("parallel", "arbitrary"),
            vmem_limit_bytes=vmem_limit),
    )(x_chunks, wc, bc, wih, bih, whh, bhh, wout, bout)

    return out.reshape(Bp, GP)[:B, :M]


def reference_forward(x, params):
    """Pure-JAX reference of the PyTorch forward (eval-mode dropout)."""
    B, T, _ = x.shape
    S = T - KSIZE + 1
    H = RNN_HID
    idx = jnp.arange(S)[:, None] + jnp.arange(KSIZE)[None, :]
    patches = x[:, idx, :].reshape(B, S, KSIZE * M)
    wc = params["conv_w"].reshape(CNN_HID, KSIZE * M)
    feat = jnp.tanh(jnp.einsum("bsk,ck->bsc", patches, wc) + params["conv_b"])
    feat = feat.transpose(1, 0, 2)                                     # (S, B, C)
    h = jnp.zeros((B, H), jnp.float32)
    for s in range(S):
        x_t = feat[s]
        gi = x_t @ params["gru_w_ih"].T + params["gru_b_ih"]
        gh = h @ params["gru_w_hh"].T + params["gru_b_hh"]
        r = jax.nn.sigmoid(gi[:, :H] + gh[:, :H])
        z = jax.nn.sigmoid(gi[:, H:2 * H] + gh[:, H:2 * H])
        n = jnp.tanh(gi[:, 2 * H:] + r * gh[:, 2 * H:])
        h = (1.0 - z) * n + z * h
    return h @ params["out_w"].T + params["out_b"]


def init_params(key):
    ks = jax.random.split(key, 8)

    def uinit(k, shape, fan_in):
        bound = 1.0 / np.sqrt(fan_in)
        return jax.random.uniform(k, shape, jnp.float32, -bound, bound)

    return {
        # Conv2d(1, 100, (6, 30))
        "conv_w": uinit(ks[0], (CNN_HID, 1, KSIZE, M), KSIZE * M),
        "conv_b": uinit(ks[1], (CNN_HID,), KSIZE * M),
        # GRU(input=100, hidden=100), gate order (r, z, n)
        "gru_w_ih": uinit(ks[2], (3 * RNN_HID, CNN_HID), RNN_HID),
        "gru_w_hh": uinit(ks[3], (3 * RNN_HID, RNN_HID), RNN_HID),
        "gru_b_ih": uinit(ks[4], (3 * RNN_HID,), RNN_HID),
        "gru_b_hh": uinit(ks[5], (3 * RNN_HID,), RNN_HID),
        # Linear(100, 30)
        "out_w": uinit(ks[6], (M, RNN_HID), RNN_HID),
        "out_b": uinit(ks[7], (M,), RNN_HID),
    }


if __name__ == "__main__":
    key = jax.random.PRNGKey(0)
    k_par, k_x = jax.random.split(key)
    params = init_params(k_par)

    B, T = 2, 8                      # small batch / seq; feature width fixed at 30
    x = jax.random.normal(k_x, (B, T, M), jnp.float32)

    out = jax.jit(network_forward)(x, params)
    out = jax.block_until_ready(out)

    ref = reference_forward(x, params)
    np.testing.assert_allclose(np.asarray(out), np.asarray(ref),
                               rtol=2e-5, atol=2e-5)
    assert out.shape == (B, M)
    print("KERNEL_OK")
</pallas_src>

<mosaic_0001>
module attributes {stable_mosaic.version = 11 : i64} {
  func.func @kernel(%arg0: i32, %arg1: i32, %arg2: memref<1x1x104x30xf32, #tpu.memory_space<vmem>>, %arg3: memref<6x30x128xf32, #tpu.memory_space<vmem>>, %arg4: memref<1x128xf32, #tpu.memory_space<vmem>>, %arg5: memref<128x384xf32, #tpu.memory_space<vmem>>, %arg6: memref<1x384xf32, #tpu.memory_space<vmem>>, %arg7: memref<128x384xf32, #tpu.memory_space<vmem>>, %arg8: memref<1x384xf32, #tpu.memory_space<vmem>>, %arg9: memref<128x128xf32, #tpu.memory_space<vmem>>, %arg10: memref<1x128xf32, #tpu.memory_space<vmem>>, %arg11: memref<1x8x128xf32, #tpu.memory_space<vmem>>, %arg12: memref<64x384xf32, #tpu.memory_space<vmem>>, %arg13: memref<8x128xf32, #tpu.memory_space<vmem>>) attributes {dimension_semantics = [#tpu.dimension_semantics<parallel>, #tpu.dimension_semantics<arbitrary>], iteration_bounds = array<i64: 1, 1>, scalar_prefetch = 0 : i64, scratch_operands = 2 : i64, tpu.core_type = #tpu.core_type<tc>, window_params = [{transform_indices = @transform_0, window_bounds = array<i64: 1, 1, 104, 30>}, {pipeline_mode = #tpu.pipeline_mode<synchronous>, transform_indices = @transform_1, window_bounds = array<i64: 6, 30, 128>}, {pipeline_mode = #tpu.pipeline_mode<synchronous>, transform_indices = @transform_2, window_bounds = array<i64: 1, 128>}, {pipeline_mode = #tpu.pipeline_mode<synchronous>, transform_indices = @transform_3, window_bounds = array<i64: 128, 384>}, {pipeline_mode = #tpu.pipeline_mode<synchronous>, transform_indices = @transform_4, window_bounds = array<i64: 1, 384>}, {pipeline_mode = #tpu.pipeline_mode<synchronous>, transform_indices = @transform_5, window_bounds = array<i64: 128, 384>}, {pipeline_mode = #tpu.pipeline_mode<synchronous>, transform_indices = @transform_6, window_bounds = array<i64: 1, 384>}, {pipeline_mode = #tpu.pipeline_mode<synchronous>, transform_indices = @transform_7, window_bounds = array<i64: 128, 128>}, {pipeline_mode = #tpu.pipeline_mode<synchronous>, transform_indices = @transform_8, window_bounds = array<i64: 1, 128>}, {transform_indices = @transform_9, window_bounds = array<i64: 1, 8, 128>}]} {
    %c0_i32 = arith.constant 0 : i32
    %0 = arith.cmpi eq, %arg1, %c0_i32 : i32
    %1 = arith.extui %0 : i1 to i32
    %c0_i32_0 = arith.constant 0 : i32
    %2 = arith.cmpi ne, %1, %c0_i32_0 : i32
    scf.if %2 {
      %cst_134 = arith.constant 0.000000e+00 : f32
      %350 = vector.broadcast %cst_134 : f32 to vector<8x128xf32>
      %c0_135 = arith.constant 0 : index
      %c0_136 = arith.constant 0 : index
      %351 = vector.load %arg13[%c0_135, %c0_136] : memref<8x128xf32, #tpu.memory_space<vmem>>, vector<8x128xf32>
      tpu.vector_store %arg13[%c0_135, %c0_136], %350 {strides = array<i32>} : memref<8x128xf32, #tpu.memory_space<vmem>>, vector<8x128xf32>,
    } else {
    }
    %c0 = arith.constant 0 : index
    %c0_1 = arith.constant 0 : index
    %c0_2 = arith.constant 0 : index
    %c0_3 = arith.constant 0 : index
    %3 = vector.load %arg2[%c0, %c0_1, %c0_2, %c0_3] : memref<1x1x104x30xf32, #tpu.memory_space<vmem>>, vector<1x1x64x30xf32>
    %4 = vector.shape_cast %3 : vector<1x1x64x30xf32> to vector<64x30xf32>
    %c0_4 = arith.constant 0 : index
    %c0_5 = arith.constant 0 : index
    %c0_6 = arith.constant 0 : index
    %5 = vector.load %arg3[%c0_4, %c0_5, %c0_6] : memref<6x30x128xf32, #tpu.memory_space<vmem>>, vector<1x30x128xf32>
    %6 = vector.shape_cast %5 : vector<1x30x128xf32> to vector<30x128xf32>
    %cst = arith.constant dense<0.000000e+00> : vector<64x128xf32>
    %7 = tpu.matmul %4, %6, %cst {dimension_numbers = #tpu.dot_dimension_numbers<[1], [0], [0], [1], [0, 0, 1, 1], [], []>} : vector<64x30xf32>, vector<30x128xf32>, vector<64x128xf32> -> vector<64x128xf32>
    %c0_7 = arith.constant 0 : index
    %c0_8 = arith.constant 0 : index
    %c8 = arith.constant 8 : index
    %c0_9 = arith.constant 0 : index
    %8 = vector.load %arg2[%c0_7, %c0_8, %c8, %c0_9] : memref<1x1x104x30xf32, #tpu.memory_space<vmem>>, vector<1x1x64x30xf32>
    %9 = vector.shape_cast %8 : vector<1x1x64x30xf32> to vector<64x30xf32>
    %c1 = arith.constant 1 : index
    %c0_10 = arith.constant 0 : index
    %c0_11 = arith.constant 0 : index
    %10 = vector.load %arg3[%c1, %c0_10, %c0_11] : memref<6x30x128xf32, #tpu.memory_space<vmem>>, vector<1x30x128xf32>
    %11 = vector.shape_cast %10 : vector<1x30x128xf32> to vector<30x128xf32>
    %cst_12 = arith.constant dense<0.000000e+00> : vector<64x128xf32>
    %12 = tpu.matmul %9, %11, %cst_12 {dimension_numbers = #tpu.dot_dimension_numbers<[1], [0], [0], [1], [0, 0, 1, 1], [], []>} : vector<64x30xf32>, vector<30x128xf32>, vector<64x128xf32> -> vector<64x128xf32>
    %13 = arith.addf %7, %12 : vector<64x128xf32>
    %c0_13 = arith.constant 0 : index
    %c0_14 = arith.constant 0 : index
    %c16 = arith.constant 16 : index
    %c0_15 = arith.constant 0 : index
    %14 = vector.load %arg2[%c0_13, %c0_14, %c16, %c0_15] : memref<1x1x104x30xf32, #tpu.memory_space<vmem>>, vector<1x1x64x30xf32>
    %15 = vector.shape_cast %14 : vector<1x1x64x30xf32> to vector<64x30xf32>
    %c2 = arith.constant 2 : index
    %c0_16 = arith.constant 0 : index
    %c0_17 = arith.constant 0 : index
    %16 = vector.load %arg3[%c2, %c0_16, %c0_17] : memref<6x30x128xf32, #tpu.memory_space<vmem>>, vector<1x30x128xf32>
    %17 = vector.shape_cast %16 : vector<1x30x128xf32> to vector<30x128xf32>
    %cst_18 = arith.constant dense<0.000000e+00> : vector<64x128xf32>
    %18 = tpu.matmul %15, %17, %cst_18 {dimension_numbers = #tpu.dot_dimension_numbers<[1], [0], [0], [1], [0, 0, 1, 1], [], []>} : vector<64x30xf32>, vector<30x128xf32>, vector<64x128xf32> -> vector<64x128xf32>
    %19 = arith.addf %13, %18 : vector<64x128xf32>
    %c0_19 = arith.constant 0 : index
    %c0_20 = arith.constant 0 : index
    %c24 = arith.constant 24 : index
    %c0_21 = arith.constant 0 : index
    %20 = vector.load %arg2[%c0_19, %c0_20, %c24, %c0_21] : memref<1x1x104x30xf32, #tpu.memory_space<vmem>>, vector<1x1x64x30xf32>
    %21 = vector.shape_cast %20 : vector<1x1x64x30xf32> to vector<64x30xf32>
    %c3 = arith.constant 3 : index
    %c0_22 = arith.constant 0 : index
    %c0_23 = arith.constant 0 : index
    %22 = vector.load %arg3[%c3, %c0_22, %c0_23] : memref<6x30x128xf32, #tpu.memory_space<vmem>>, vector<1x30x128xf32>
    %23 = vector.shape_cast %22 : vector<1x30x128xf32> to vector<30x128xf32>
    %cst_24 = arith.constant dense<0.000000e+00> : vector<64x128xf32>
    %24 = tpu.matmul %21, %23, %cst_24 {dimension_numbers = #tpu.dot_dimension_numbers<[1], [0], [0], [1], [0, 0, 1, 1], [], []>} : vector<64x30xf32>, vector<30x128xf32>, vector<64x128xf32> -> vector<64x128xf32>
    %25 = arith.addf %19, %24 : vector<64x128xf32>
    %c0_25 = arith.constant 0 : index
    %c0_26 = arith.constant 0 : index
    %c32 = arith.constant 32 : index
    %c0_27 = arith.constant 0 : index
    %26 = vector.load %arg2[%c0_25, %c0_26, %c32, %c0_27] : memref<1x1x104x30xf32, #tpu.memory_space<vmem>>, vector<1x1x64x30xf32>
    %27 = vector.shape_cast %26 : vector<1x1x64x30xf32> to vector<64x30xf32>
    %c4 = arith.constant 4 : index
    %c0_28 = arith.constant 0 : index
    %c0_29 = arith.constant 0 : index
    %28 = vector.load %arg3[%c4, %c0_28, %c0_29] : memref<6x30x128xf32, #tpu.memory_space<vmem>>, vector<1x30x128xf32>
    %29 = vector.shape_cast %28 : vector<1x30x128xf32> to vector<30x128xf32>
    %cst_30 = arith.constant dense<0.000000e+00> : vector<64x128xf32>
    %30 = tpu.matmul %27, %29, %cst_30 {dimension_numbers = #tpu.dot_dimension_numbers<[1], [0], [0], [1], [0, 0, 1, 1], [], []>} : vector<64x30xf32>, vector<30x128xf32>, vector<64x128xf32> -> vector<64x128xf32>
    %31 = arith.addf %25, %30 : vector<64x128xf32>
    %c0_31 = arith.constant 0 : index
    %c0_32 = arith.constant 0 : index
    %c40 = arith.constant 40 : index
    %c0_33 = arith.constant 0 : index
    %32 = vector.load %arg2[%c0_31, %c0_32, %c40, %c0_33] : memref<1x1x104x30xf32, #tpu.memory_space<vmem>>, vector<1x1x64x30xf32>
    %33 = vector.shape_cast %32 : vector<1x1x64x30xf32> to vector<64x30xf32>
    %c5 = arith.constant 5 : index
    %c0_34 = arith.constant 0 : index
    %c0_35 = arith.constant 0 : index
    %34 = vector.load %arg3[%c5, %c0_34, %c0_35] : memref<6x30x128xf32, #tpu.memory_space<vmem>>, vector<1x30x128xf32>
    %35 = vector.shape_cast %34 : vector<1x30x128xf32> to vector<30x128xf32>
    %cst_36 = arith.constant dense<0.000000e+00> : vector<64x128xf32>
    %36 = tpu.matmul %33, %35, %cst_36 {dimension_numbers = #tpu.dot_dimension_numbers<[1], [0], [0], [1], [0, 0, 1, 1], [], []>} : vector<64x30xf32>, vector<30x128xf32>, vector<64x128xf32> -> vector<64x128xf32>
    %37 = arith.addf %31, %36 : vector<64x128xf32>
    %c0_37 = arith.constant 0 : index
    %c0_38 = arith.constant 0 : index
    %38 = vector.load %arg4[%c0_37, %c0_38] : memref<1x128xf32, #tpu.memory_space<vmem>>, vector<1x128xf32>
    %39 = vector.broadcast %38 : vector<1x128xf32> to vector<64x128xf32>
    %40 = arith.addf %37, %39 : vector<64x128xf32>
    %41 = math.tanh %40 : vector<64x128xf32>
    %c0_39 = arith.constant 0 : index
    %c0_40 = arith.constant 0 : index
    %42 = vector.load %arg5[%c0_39, %c0_40] : memref<128x384xf32, #tpu.memory_space<vmem>>, vector<128x384xf32>
    %cst_41 = arith.constant dense<0.000000e+00> : vector<64x384xf32>
    %43 = tpu.matmul %41, %42, %cst_41 {dimension_numbers = #tpu.dot_dimension_numbers<[1], [0], [0], [1], [0, 0, 1, 1], [], []>} : vector<64x128xf32>, vector<128x384xf32>, vector<64x384xf32> -> vector<64x384xf32>
    %c0_42 = arith.constant 0 : index
    %c0_43 = arith.constant 0 : index
    %44 = vector.load %arg6[%c0_42, %c0_43] : memref<1x384xf32, #tpu.memory_space<vmem>>, vector<1x384xf32>
    %45 = vector.broadcast %44 : vector<1x384xf32> to vector<64x384xf32>
    %46 = arith.addf %43, %45 : vector<64x384xf32>
    %c0_44 = arith.constant 0 : index
    %c0_45 = arith.constant 0 : index
    %47 = vector.load %arg12[%c0_44, %c0_45] : memref<64x384xf32, #tpu.memory_space<vmem>>, vector<64x384xf32>
    tpu.vector_store %arg12[%c0_44, %c0_45], %46 {strides = array<i32>} : memref<64x384xf32, #tpu.memory_space<vmem>>, vector<64x384xf32>,
    %c8_i32 = arith.constant 8 : i32
    %48 = arith.muli %arg1, %c8_i32 : i32
    %c0_46 = arith.constant 0 : index
    %c0_47 = arith.constant 0 : index
    %49 = vector.load %arg8[%c0_46, %c0_47] : memref<1x384xf32, #tpu.memory_space<vmem>>, vector<1x384xf32>
    %50 = vector.shape_cast %49 : vector<1x384xf32> to vector<1x384xf32>
    %51 = vector.broadcast %50 : vector<1x384xf32> to vector<8x384xf32>
    %c0_48 = arith.constant 0 : index
    %c0_49 = arith.constant 0 : index
    %52 = vector.load %arg13[%c0_48, %c0_49] : memref<8x128xf32, #tpu.memory_space<vmem>>, vector<8x128xf32>
    %c0_i32_50 = arith.constant 0 : i32
    %c8_i32_51 = arith.constant 8 : i32
    %53 = arith.muli %c0_i32_50, %c8_i32_51 : i32
    %54 = tpu.assume_multiple %53, 8 : i32
    %55 = arith.index_cast %54 : i32 to index
    %c0_52 = arith.constant 0 : index
    %56 = vector.load %arg12[%55, %c0_52] : memref<64x384xf32, #tpu.memory_space<vmem>>, vector<8x384xf32>
    %c0_53 = arith.constant 0 : index
    %c0_54 = arith.constant 0 : index
    %57 = vector.load %arg7[%c0_53, %c0_54] : memref<128x384xf32, #tpu.memory_space<vmem>>, vector<128x384xf32>
    %cst_55 = arith.constant dense<0.000000e+00> : vector<8x384xf32>
    %58 = tpu.matmul %52, %57, %cst_55 {dimension_numbers = #tpu.dot_dimension_numbers<[1], [0], [0], [1], [0, 0, 1, 1], [], []>} : vector<8x128xf32>, vector<128x384xf32>, vector<8x384xf32> -> vector<8x384xf32>
    %59 = arith.addf %58, %51 : vector<8x384xf32>
    %60 = vector.extract_strided_slice %56 {offsets = [0, 0], sizes = [8, 128], strides = [1, 1]} : vector<8x384xf32> to vector<8x128xf32>
    %61 = vector.extract_strided_slice %59 {offsets = [0, 0], sizes = [8, 128], strides = [1, 1]} : vector<8x384xf32> to vector<8x128xf32>
    %62 = arith.addf %60, %61 : vector<8x128xf32>
    %63 = arith.negf %62 : vector<8x128xf32>
    %64 = math.exp %63 : vector<8x128xf32>
    %cst_56 = arith.constant 1.000000e+00 : f32
    %65 = vector.broadcast %cst_56 : f32 to vector<8x128xf32>
    %66 = arith.addf %65, %64 : vector<8x128xf32>
    %67 = arith.divf %65, %66 : vector<8x128xf32>
    %68 = vector.extract_strided_slice %56 {offsets = [0, 128], sizes = [8, 128], strides = [1, 1]} : vector<8x384xf32> to vector<8x128xf32>
    %69 = vector.extract_strided_slice %59 {offsets = [0, 128], sizes = [8, 128], strides = [1, 1]} : vector<8x384xf32> to vector<8x128xf32>
    %70 = arith.addf %68, %69 : vector<8x128xf32>
    %71 = arith.negf %70 : vector<8x128xf32>
    %72 = math.exp %71 : vector<8x128xf32>
    %cst_57 = arith.constant 1.000000e+00 : f32
    %73 = vector.broadcast %cst_57 : f32 to vector<8x128xf32>
    %74 = arith.addf %73, %72 : vector<8x128xf32>
    %75 = arith.divf %73, %74 : vector<8x128xf32>
    %76 = vector.extract_strided_slice %56 {offsets = [0, 256], sizes = [8, 128], strides = [1, 1]} : vector<8x384xf32> to vector<8x128xf32>
    %77 = vector.extract_strided_slice %59 {offsets = [0, 256], sizes = [8, 128], strides = [1, 1]} : vector<8x384xf32> to vector<8x128xf32>
    %78 = arith.mulf %67, %77 : vector<8x128xf32>
    %79 = arith.addf %76, %78 : vector<8x128xf32>
    %80 = math.tanh %79 : vector<8x128xf32>
    %cst_58 = arith.constant 1.000000e+00 : f32
    %81 = vector.broadcast %cst_58 : f32 to vector<8x128xf32>
    %82 = arith.subf %81, %75 : vector<8x128xf32>
    %83 = arith.mulf %82, %80 : vector<8x128xf32>
    %84 = arith.mulf %75, %52 : vector<8x128xf32>
    %85 = arith.addf %83, %84 : vector<8x128xf32>
    %86 = arith.addi %48, %c0_i32_50 : i32
    %c3_i32 = arith.constant 3 : i32
    %87 = arith.cmpi slt, %86, %c3_i32 : i32
    %88 = arith.select %87, %85, %52 : vector<8x128xf32>
    %c1_i32 = arith.constant 1 : i32
    %c8_i32_59 = arith.constant 8 : i32
    %89 = arith.muli %c1_i32, %c8_i32_59 : i32
    %90 = tpu.assume_multiple %89, 8 : i32
    %91 = arith.index_cast %90 : i32 to index
    %c0_60 = arith.constant 0 : index
    %92 = vector.load %arg12[%91, %c0_60] : memref<64x384xf32, #tpu.memory_space<vmem>>, vector<8x384xf32>
    %c0_61 = arith.constant 0 : index
    %c0_62 = arith.constant 0 : index
    %93 = vector.load %arg7[%c0_61, %c0_62] : memref<128x384xf32, #tpu.memory_space<vmem>>, vector<128x384xf32>
    %cst_63 = arith.constant dense<0.000000e+00> : vector<8x384xf32>
    %94 = tpu.matmul %88, %93, %cst_63 {dimension_numbers = #tpu.dot_dimension_numbers<[1], [0], [0], [1], [0, 0, 1, 1], [], []>} : vector<8x128xf32>, vector<128x384xf32>, vector<8x384xf32> -> vector<8x384xf32>
    %95 = arith.addf %94, %51 : vector<8x384xf32>
    %96 = vector.extract_strided_slice %92 {offsets = [0, 0], sizes = [8, 128], strides = [1, 1]} : vector<8x384xf32> to vector<8x128xf32>
    %97 = vector.extract_strided_slice %95 {offsets = [0, 0], sizes = [8, 128], strides = [1, 1]} : vector<8x384xf32> to vector<8x128xf32>
    %98 = arith.addf %96, %97 : vector<8x128xf32>
    %99 = arith.negf %98 : vector<8x128xf32>
    %100 = math.exp %99 : vector<8x128xf32>
    %cst_64 = arith.constant 1.000000e+00 : f32
    %101 = vector.broadcast %cst_64 : f32 to vector<8x128xf32>
    %102 = arith.addf %101, %100 : vector<8x128xf32>
    %103 = arith.divf %101, %102 : vector<8x128xf32>
    %104 = vector.extract_strided_slice %92 {offsets = [0, 128], sizes = [8, 128], strides = [1, 1]} : vector<8x384xf32> to vector<8x128xf32>
    %105 = vector.extract_strided_slice %95 {offsets = [0, 128], sizes = [8, 128], strides = [1, 1]} : vector<8x384xf32> to vector<8x128xf32>
    %106 = arith.addf %104, %105 : vector<8x128xf32>
    %107 = arith.negf %106 : vector<8x128xf32>
    %108 = math.exp %107 : vector<8x128xf32>
    %cst_65 = arith.constant 1.000000e+00 : f32
    %109 = vector.broadcast %cst_65 : f32 to vector<8x128xf32>
    %110 = arith.addf %109, %108 : vector<8x128xf32>
    %111 = arith.divf %109, %110 : vector<8x128xf32>
    %112 = vector.extract_strided_slice %92 {offsets = [0, 256], sizes = [8, 128], strides = [1, 1]} : vector<8x384xf32> to vector<8x128xf32>
    %113 = vector.extract_strided_slice %95 {offsets = [0, 256], sizes = [8, 128], strides = [1, 1]} : vector<8x384xf32> to vector<8x128xf32>
    %114 = arith.mulf %103, %113 : vector<8x128xf32>
    %115 = arith.addf %112, %114 : vector<8x128xf32>
    %116 = math.tanh %115 : vector<8x128xf32>
    %cst_66 = arith.constant 1.000000e+00 : f32
    %117 = vector.broadcast %cst_66 : f32 to vector<8x128xf32>
    %118 = arith.subf %117, %111 : vector<8x128xf32>
    %119 = arith.mulf %118, %116 : vector<8x128xf32>
    %120 = arith.mulf %111, %88 : vector<8x128xf32>
    %121 = arith.addf %119, %120 : vector<8x128xf32>
    %122 = arith.addi %48, %c1_i32 : i32
    %c3_i32_67 = arith.constant 3 : i32
    %123 = arith.cmpi slt, %122, %c3_i32_67 : i32
    %124 = arith.select %123, %121, %88 : vector<8x128xf32>
    %c2_i32 = arith.constant 2 : i32
    %c8_i32_68 = arith.constant 8 : i32
    %125 = arith.muli %c2_i32, %c8_i32_68 : i32
    %126 = tpu.assume_multiple %125, 8 : i32
    %127 = arith.index_cast %126 : i32 to index
    %c0_69 = arith.constant 0 : index
    %128 = vector.load %arg12[%127, %c0_69] : memref<64x384xf32, #tpu.memory_space<vmem>>, vector<8x384xf32>
    %c0_70 = arith.constant 0 : index
    %c0_71 = arith.constant 0 : index
    %129 = vector.load %arg7[%c0_70, %c0_71] : memref<128x384xf32, #tpu.memory_space<vmem>>, vector<128x384xf32>
    %cst_72 = arith.constant dense<0.000000e+00> : vector<8x384xf32>
    %130 = tpu.matmul %124, %129, %cst_72 {dimension_numbers = #tpu.dot_dimension_numbers<[1], [0], [0], [1], [0, 0, 1, 1], [], []>} : vector<8x128xf32>, vector<128x384xf32>, vector<8x384xf32> -> vector<8x384xf32>
    %131 = arith.addf %130, %51 : vector<8x384xf32>
    %132 = vector.extract_strided_slice %128 {offsets = [0, 0], sizes = [8, 128], strides = [1, 1]} : vector<8x384xf32> to vector<8x128xf32>
    %133 = vector.extract_strided_slice %131 {offsets = [0, 0], sizes = [8, 128], strides = [1, 1]} : vector<8x384xf32> to vector<8x128xf32>
    %134 = arith.addf %132, %133 : vector<8x128xf32>
    %135 = arith.negf %134 : vector<8x128xf32>
    %136 = math.exp %135 : vector<8x128xf32>
    %cst_73 = arith.constant 1.000000e+00 : f32
    %137 = vector.broadcast %cst_73 : f32 to vector<8x128xf32>
    %138 = arith.addf %137, %136 : vector<8x128xf32>
    %139 = arith.divf %137, %138 : vector<8x128xf32>
    %140 = vector.extract_strided_slice %128 {offsets = [0, 128], sizes = [8, 128], strides = [1, 1]} : vector<8x384xf32> to vector<8x128xf32>
    %141 = vector.extract_strided_slice %131 {offsets = [0, 128], sizes = [8, 128], strides = [1, 1]} : vector<8x384xf32> to vector<8x128xf32>
    %142 = arith.addf %140, %141 : vector<8x128xf32>
    %143 = arith.negf %142 : vector<8x128xf32>
    %144 = math.exp %143 : vector<8x128xf32>
    %cst_74 = arith.constant 1.000000e+00 : f32
    %145 = vector.broadcast %cst_74 : f32 to vector<8x128xf32>
    %146 = arith.addf %145, %144 : vector<8x128xf32>
    %147 = arith.divf %145, %146 : vector<8x128xf32>
    %148 = vector.extract_strided_slice %128 {offsets = [0, 256], sizes = [8, 128], strides = [1, 1]} : vector<8x384xf32> to vector<8x128xf32>
    %149 = vector.extract_strided_slice %131 {offsets = [0, 256], sizes = [8, 128], strides = [1, 1]} : vector<8x384xf32> to vector<8x128xf32>
    %150 = arith.mulf %139, %149 : vector<8x128xf32>
    %151 = arith.addf %148, %150 : vector<8x128xf32>
    %152 = math.tanh %151 : vector<8x128xf32>
    %cst_75 = arith.constant 1.000000e+00 : f32
    %153 = vector.broadcast %cst_75 : f32 to vector<8x128xf32>
    %154 = arith.subf %153, %147 : vector<8x128xf32>
    %155 = arith.mulf %154, %152 : vector<8x128xf32>
    %156 = arith.mulf %147, %124 : vector<8x128xf32>
    %157 = arith.addf %155, %156 : vector<8x128xf32>
    %158 = arith.addi %48, %c2_i32 : i32
    %c3_i32_76 = arith.constant 3 : i32
    %159 = arith.cmpi slt, %158, %c3_i32_76 : i32
    %160 = arith.select %159, %157, %124 : vector<8x128xf32>
    %c3_i32_77 = arith.constant 3 : i32
    %c8_i32_78 = arith.constant 8 : i32
    %161 = arith.muli %c3_i32_77, %c8_i32_78 : i32
    %162 = tpu.assume_multiple %161, 8 : i32
    %163 = arith.index_cast %162 : i32 to index
    %c0_79 = arith.constant 0 : index
    %164 = vector.load %arg12[%163, %c0_79] : memref<64x384xf32, #tpu.memory_space<vmem>>, vector<8x384xf32>
    %c0_80 = arith.constant 0 : index
    %c0_81 = arith.constant 0 : index
    %165 = vector.load %arg7[%c0_80, %c0_81] : memref<128x384xf32, #tpu.memory_space<vmem>>, vector<128x384xf32>
    %cst_82 = arith.constant dense<0.000000e+00> : vector<8x384xf32>
    %166 = tpu.matmul %160, %165, %cst_82 {dimension_numbers = #tpu.dot_dimension_numbers<[1], [0], [0], [1], [0, 0, 1, 1], [], []>} : vector<8x128xf32>, vector<128x384xf32>, vector<8x384xf32> -> vector<8x384xf32>
    %167 = arith.addf %166, %51 : vector<8x384xf32>
    %168 = vector.extract_strided_slice %164 {offsets = [0, 0], sizes = [8, 128], strides = [1, 1]} : vector<8x384xf32> to vector<8x128xf32>
    %169 = vector.extract_strided_slice %167 {offsets = [0, 0], sizes = [8, 128], strides = [1, 1]} : vector<8x384xf32> to vector<8x128xf32>
    %170 = arith.addf %168, %169 : vector<8x128xf32>
    %171 = arith.negf %170 : vector<8x128xf32>
    %172 = math.exp %171 : vector<8x128xf32>
    %cst_83 = arith.constant 1.000000e+00 : f32
    %173 = vector.broadcast %cst_83 : f32 to vector<8x128xf32>
    %174 = arith.addf %173, %172 : vector<8x128xf32>
    %175 = arith.divf %173, %174 : vector<8x128xf32>
    %176 = vector.extract_strided_slice %164 {offsets = [0, 128], sizes = [8, 128], strides = [1, 1]} : vector<8x384xf32> to vector<8x128xf32>
    %177 = vector.extract_strided_slice %167 {offsets = [0, 128], sizes = [8, 128], strides = [1, 1]} : vector<8x384xf32> to vector<8x128xf32>
    %178 = arith.addf %176, %177 : vector<8x128xf32>
    %179 = arith.negf %178 : vector<8x128xf32>
    %180 = math.exp %179 : vector<8x128xf32>
    %cst_84 = arith.constant 1.000000e+00 : f32
    %181 = vector.broadcast %cst_84 : f32 to vector<8x128xf32>
    %182 = arith.addf %181, %180 : vector<8x128xf32>
    %183 = arith.divf %181, %182 : vector<8x128xf32>
    %184 = vector.extract_strided_slice %164 {offsets = [0, 256], sizes = [8, 128], strides = [1, 1]} : vector<8x384xf32> to vector<8x128xf32>
    %185 = vector.extract_strided_slice %167 {offsets = [0, 256], sizes = [8, 128], strides = [1, 1]} : vector<8x384xf32> to vector<8x128xf32>
    %186 = arith.mulf %175, %185 : vector<8x128xf32>
    %187 = arith.addf %184, %186 : vector<8x128xf32>
    %188 = math.tanh %187 : vector<8x128xf32>
    %cst_85 = arith.constant 1.000000e+00 : f32
    %189 = vector.broadcast %cst_85 : f32 to vector<8x128xf32>
    %190 = arith.subf %189, %183 : vector<8x128xf32>
    %191 = arith.mulf %190, %188 : vector<8x128xf32>
    %192 = arith.mulf %183, %160 : vector<8x128xf32>
    %193 = arith.addf %191, %192 : vector<8x128xf32>
    %194 = arith.addi %48, %c3_i32_77 : i32
    %c3_i32_86 = arith.constant 3 : i32
    %195 = arith.cmpi slt, %194, %c3_i32_86 : i32
    %196 = arith.select %195, %193, %160 : vector<8x128xf32>
    %c4_i32 = arith.constant 4 : i32
    %c8_i32_87 = arith.constant 8 : i32
    %197 = arith.muli %c4_i32, %c8_i32_87 : i32
    %198 = tpu.assume_multiple %197, 8 : i32
    %199 = arith.index_cast %198 : i32 to index
    %c0_88 = arith.constant 0 : index
    %200 = vector.load %arg12[%199, %c0_88] : memref<64x384xf32, #tpu.memory_space<vmem>>, vector<8x384xf32>
    %c0_89 = arith.constant 0 : index
    %c0_90 = arith.constant 0 : index
    %201 = vector.load %arg7[%c0_89, %c0_90] : memref<128x384xf32, #tpu.memory_space<vmem>>, vector<128x384xf32>
    %cst_91 = arith.constant dense<0.000000e+00> : vector<8x384xf32>
    %202 = tpu.matmul %196, %201, %cst_91 {dimension_numbers = #tpu.dot_dimension_numbers<[1], [0], [0], [1], [0, 0, 1, 1], [], []>} : vector<8x128xf32>, vector<128x384xf32>, vector<8x384xf32> -> vector<8x384xf32>
    %203 = arith.addf %202, %51 : vector<8x384xf32>
    %204 = vector.extract_strided_slice %200 {offsets = [0, 0], sizes = [8, 128], strides = [1, 1]} : vector<8x384xf32> to vector<8x128xf32>
    %205 = vector.extract_strided_slice %203 {offsets = [0, 0], sizes = [8, 128], strides = [1, 1]} : vector<8x384xf32> to vector<8x128xf32>
    %206 = arith.addf %204, %205 : vector<8x128xf32>
    %207 = arith.negf %206 : vector<8x128xf32>
    %208 = math.exp %207 : vector<8x128xf32>
    %cst_92 = arith.constant 1.000000e+00 : f32
    %209 = vector.broadcast %cst_92 : f32 to vector<8x128xf32>
    %210 = arith.addf %209, %208 : vector<8x128xf32>
    %211 = arith.divf %209, %210 : vector<8x128xf32>
    %212 = vector.extract_strided_slice %200 {offsets = [0, 128], sizes = [8, 128], strides = [1, 1]} : vector<8x384xf32> to vector<8x128xf32>
    %213 = vector.extract_strided_slice %203 {offsets = [0, 128], sizes = [8, 128], strides = [1, 1]} : vector<8x384xf32> to vector<8x128xf32>
    %214 = arith.addf %212, %213 : vector<8x128xf32>
    %215 = arith.negf %214 : vector<8x128xf32>
    %216 = math.exp %215 : vector<8x128xf32>
    %cst_93 = arith.constant 1.000000e+00 : f32
    %217 = vector.broadcast %cst_93 : f32 to vector<8x128xf32>
    %218 = arith.addf %217, %216 : vector<8x128xf32>
    %219 = arith.divf %217, %218 : vector<8x128xf32>
    %220 = vector.extract_strided_slice %200 {offsets = [0, 256], sizes = [8, 128], strides = [1, 1]} : vector<8x384xf32> to vector<8x128xf32>
    %221 = vector.extract_strided_slice %203 {offsets = [0, 256], sizes = [8, 128], strides = [1, 1]} : vector<8x384xf32> to vector<8x128xf32>
    %222 = arith.mulf %211, %221 : vector<8x128xf32>
    %223 = arith.addf %220, %222 : vector<8x128xf32>
    %224 = math.tanh %223 : vector<8x128xf32>
    %cst_94 = arith.constant 1.000000e+00 : f32
    %225 = vector.broadcast %cst_94 : f32 to vector<8x128xf32>
    %226 = arith.subf %225, %219 : vector<8x128xf32>
    %227 = arith.mulf %226, %224 : vector<8x128xf32>
    %228 = arith.mulf %219, %196 : vector<8x128xf32>
    %229 = arith.addf %227, %228 : vector<8x128xf32>
    %230 = arith.addi %48, %c4_i32 : i32
    %c3_i32_95 = arith.constant 3 : i32
    %231 = arith.cmpi slt, %230, %c3_i32_95 : i32
    %232 = arith.select %231, %229, %196 : vector<8x128xf32>
    %c5_i32 = arith.constant 5 : i32
    %c8_i32_96 = arith.constant 8 : i32
    %233 = arith.muli %c5_i32, %c8_i32_96 : i32
    %234 = tpu.assume_multiple %233, 8 : i32
    %235 = arith.index_cast %234 : i32 to index
    %c0_97 = arith.constant 0 : index
    %236 = vector.load %arg12[%235, %c0_97] : memref<64x384xf32, #tpu.memory_space<vmem>>, vector<8x384xf32>
    %c0_98 = arith.constant 0 : index
    %c0_99 = arith.constant 0 : index
    %237 = vector.load %arg7[%c0_98, %c0_99] : memref<128x384xf32, #tpu.memory_space<vmem>>, vector<128x384xf32>
    %cst_100 = arith.constant dense<0.000000e+00> : vector<8x384xf32>
    %238 = tpu.matmul %232, %237, %cst_100 {dimension_numbers = #tpu.dot_dimension_numbers<[1], [0], [0], [1], [0, 0, 1, 1], [], []>} : vector<8x128xf32>, vector<128x384xf32>, vector<8x384xf32> -> vector<8x384xf32>
    %239 = arith.addf %238, %51 : vector<8x384xf32>
    %240 = vector.extract_strided_slice %236 {offsets = [0, 0], sizes = [8, 128], strides = [1, 1]} : vector<8x384xf32> to vector<8x128xf32>
    %241 = vector.extract_strided_slice %239 {offsets = [0, 0], sizes = [8, 128], strides = [1, 1]} : vector<8x384xf32> to vector<8x128xf32>
    %242 = arith.addf %240, %241 : vector<8x128xf32>
    %243 = arith.negf %242 : vector<8x128xf32>
    %244 = math.exp %243 : vector<8x128xf32>
    %cst_101 = arith.constant 1.000000e+00 : f32
    %245 = vector.broadcast %cst_101 : f32 to vector<8x128xf32>
    %246 = arith.addf %245, %244 : vector<8x128xf32>
    %247 = arith.divf %245, %246 : vector<8x128xf32>
    %248 = vector.extract_strided_slice %236 {offsets = [0, 128], sizes = [8, 128], strides = [1, 1]} : vector<8x384xf32> to vector<8x128xf32>
    %249 = vector.extract_strided_slice %239 {offsets = [0, 128], sizes = [8, 128], strides = [1, 1]} : vector<8x384xf32> to vector<8x128xf32>
    %250 = arith.addf %248, %249 : vector<8x128xf32>
    %251 = arith.negf %250 : vector<8x128xf32>
    %252 = math.exp %251 : vector<8x128xf32>
    %cst_102 = arith.constant 1.000000e+00 : f32
    %253 = vector.broadcast %cst_102 : f32 to vector<8x128xf32>
    %254 = arith.addf %253, %252 : vector<8x128xf32>
    %255 = arith.divf %253, %254 : vector<8x128xf32>
    %256 = vector.extract_strided_slice %236 {offsets = [0, 256], sizes = [8, 128], strides = [1, 1]} : vector<8x384xf32> to vector<8x128xf32>
    %257 = vector.extract_strided_slice %239 {offsets = [0, 256], sizes = [8, 128], strides = [1, 1]} : vector<8x384xf32> to vector<8x128xf32>
    %258 = arith.mulf %247, %257 : vector<8x128xf32>
    %259 = arith.addf %256, %258 : vector<8x128xf32>
    %260 = math.tanh %259 : vector<8x128xf32>
    %cst_103 = arith.constant 1.000000e+00 : f32
    %261 = vector.broadcast %cst_103 : f32 to vector<8x128xf32>
    %262 = arith.subf %261, %255 : vector<8x128xf32>
    %263 = arith.mulf %262, %260 : vector<8x128xf32>
    %264 = arith.mulf %255, %232 : vector<8x128xf32>
    %265 = arith.addf %263, %264 : vector<8x128xf32>
    %266 = arith.addi %48, %c5_i32 : i32
    %c3_i32_104 = arith.constant 3 : i32
    %267 = arith.cmpi slt, %266, %c3_i32_104 : i32
    %268 = arith.select %267, %265, %232 : vector<8x128xf32>
    %c6_i32 = arith.constant 6 : i32
    %c8_i32_105 = arith.constant 8 : i32
    %269 = arith.muli %c6_i32, %c8_i32_105 : i32
    %270 = tpu.assume_multiple %269, 8 : i32
    %271 = arith.index_cast %270 : i32 to index
    %c0_106 = arith.constant 0 : index
    %272 = vector.load %arg12[%271, %c0_106] : memref<64x384xf32, #tpu.memory_space<vmem>>, vector<8x384xf32>
    %c0_107 = arith.constant 0 : index
    %c0_108 = arith.constant 0 : index
    %273 = vector.load %arg7[%c0_107, %c0_108] : memref<128x384xf32, #tpu.memory_space<vmem>>, vector<128x384xf32>
    %cst_109 = arith.constant dense<0.000000e+00> : vector<8x384xf32>
    %274 = tpu.matmul %268, %273, %cst_109 {dimension_numbers = #tpu.dot_dimension_numbers<[1], [0], [0], [1], [0, 0, 1, 1], [], []>} : vector<8x128xf32>, vector<128x384xf32>, vector<8x384xf32> -> vector<8x384xf32>
    %275 = arith.addf %274, %51 : vector<8x384xf32>
    %276 = vector.extract_strided_slice %272 {offsets = [0, 0], sizes = [8, 128], strides = [1, 1]} : vector<8x384xf32> to vector<8x128xf32>
    %277 = vector.extract_strided_slice %275 {offsets = [0, 0], sizes = [8, 128], strides = [1, 1]} : vector<8x384xf32> to vector<8x128xf32>
    %278 = arith.addf %276, %277 : vector<8x128xf32>
    %279 = arith.negf %278 : vector<8x128xf32>
    %280 = math.exp %279 : vector<8x128xf32>
    %cst_110 = arith.constant 1.000000e+00 : f32
    %281 = vector.broadcast %cst_110 : f32 to vector<8x128xf32>
    %282 = arith.addf %281, %280 : vector<8x128xf32>
    %283 = arith.divf %281, %282 : vector<8x128xf32>
    %284 = vector.extract_strided_slice %272 {offsets = [0, 128], sizes = [8, 128], strides = [1, 1]} : vector<8x384xf32> to vector<8x128xf32>
    %285 = vector.extract_strided_slice %275 {offsets = [0, 128], sizes = [8, 128], strides = [1, 1]} : vector<8x384xf32> to vector<8x128xf32>
    %286 = arith.addf %284, %285 : vector<8x128xf32>
    %287 = arith.negf %286 : vector<8x128xf32>
    %288 = math.exp %287 : vector<8x128xf32>
    %cst_111 = arith.constant 1.000000e+00 : f32
    %289 = vector.broadcast %cst_111 : f32 to vector<8x128xf32>
    %290 = arith.addf %289, %288 : vector<8x128xf32>
    %291 = arith.divf %289, %290 : vector<8x128xf32>
    %292 = vector.extract_strided_slice %272 {offsets = [0, 256], sizes = [8, 128], strides = [1, 1]} : vector<8x384xf32> to vector<8x128xf32>
    %293 = vector.extract_strided_slice %275 {offsets = [0, 256], sizes = [8, 128], strides = [1, 1]} : vector<8x384xf32> to vector<8x128xf32>
    %294 = arith.mulf %283, %293 : vector<8x128xf32>
    %295 = arith.addf %292, %294 : vector<8x128xf32>
    %296 = math.tanh %295 : vector<8x128xf32>
    %cst_112 = arith.constant 1.000000e+00 : f32
    %297 = vector.broadcast %cst_112 : f32 to vector<8x128xf32>
    %298 = arith.subf %297, %291 : vector<8x128xf32>
    %299 = arith.mulf %298, %296 : vector<8x128xf32>
    %300 = arith.mulf %291, %268 : vector<8x128xf32>
    %301 = arith.addf %299, %300 : vector<8x128xf32>
    %302 = arith.addi %48, %c6_i32 : i32
    %c3_i32_113 = arith.constant 3 : i32
    %303 = arith.cmpi slt, %302, %c3_i32_113 : i32
    %304 = arith.select %303, %301, %268 : vector<8x128xf32>
    %c7_i32 = arith.constant 7 : i32
    %c8_i32_114 = arith.constant 8 : i32
    %305 = arith.muli %c7_i32, %c8_i32_114 : i32
    %306 = tpu.assume_multiple %305, 8 : i32
    %307 = arith.index_cast %306 : i32 to index
    %c0_115 = arith.constant 0 : index
    %308 = vector.load %arg12[%307, %c0_115] : memref<64x384xf32, #tpu.memory_space<vmem>>, vector<8x384xf32>
    %c0_116 = arith.constant 0 : index
    %c0_117 = arith.constant 0 : index
    %309 = vector.load %arg7[%c0_116, %c0_117] : memref<128x384xf32, #tpu.memory_space<vmem>>, vector<128x384xf32>
    %cst_118 = arith.constant dense<0.000000e+00> : vector<8x384xf32>
    %310 = tpu.matmul %304, %309, %cst_118 {dimension_numbers = #tpu.dot_dimension_numbers<[1], [0], [0], [1], [0, 0, 1, 1], [], []>} : vector<8x128xf32>, vector<128x384xf32>, vector<8x384xf32> -> vector<8x384xf32>
    %311 = arith.addf %310, %51 : vector<8x384xf32>
    %312 = vector.extract_strided_slice %308 {offsets = [0, 0], sizes = [8, 128], strides = [1, 1]} : vector<8x384xf32> to vector<8x128xf32>
    %313 = vector.extract_strided_slice %311 {offsets = [0, 0], sizes = [8, 128], strides = [1, 1]} : vector<8x384xf32> to vector<8x128xf32>
    %314 = arith.addf %312, %313 : vector<8x128xf32>
    %315 = arith.negf %314 : vector<8x128xf32>
    %316 = math.exp %315 : vector<8x128xf32>
    %cst_119 = arith.constant 1.000000e+00 : f32
    %317 = vector.broadcast %cst_119 : f32 to vector<8x128xf32>
    %318 = arith.addf %317, %316 : vector<8x128xf32>
    %319 = arith.divf %317, %318 : vector<8x128xf32>
    %320 = vector.extract_strided_slice %308 {offsets = [0, 128], sizes = [8, 128], strides = [1, 1]} : vector<8x384xf32> to vector<8x128xf32>
    %321 = vector.extract_strided_slice %311 {offsets = [0, 128], sizes = [8, 128], strides = [1, 1]} : vector<8x384xf32> to vector<8x128xf32>
    %322 = arith.addf %320, %321 : vector<8x128xf32>
    %323 = arith.negf %322 : vector<8x128xf32>
    %324 = math.exp %323 : vector<8x128xf32>
    %cst_120 = arith.constant 1.000000e+00 : f32
    %325 = vector.broadcast %cst_120 : f32 to vector<8x128xf32>
    %326 = arith.addf %325, %324 : vector<8x128xf32>
    %327 = arith.divf %325, %326 : vector<8x128xf32>
    %328 = vector.extract_strided_slice %308 {offsets = [0, 256], sizes = [8, 128], strides = [1, 1]} : vector<8x384xf32> to vector<8x128xf32>
    %329 = vector.extract_strided_slice %311 {offsets = [0, 256], sizes = [8, 128], strides = [1, 1]} : vector<8x384xf32> to vector<8x128xf32>
    %330 = arith.mulf %319, %329 : vector<8x128xf32>
    %331 = arith.addf %328, %330 : vector<8x128xf32>
    %332 = math.tanh %331 : vector<8x128xf32>
    %cst_121 = arith.constant 1.000000e+00 : f32
    %333 = vector.broadcast %cst_121 : f32 to vector<8x128xf32>
    %334 = arith.subf %333, %327 : vector<8x128xf32>
    %335 = arith.mulf %334, %332 : vector<8x128xf32>
    %336 = arith.mulf %327, %304 : vector<8x128xf32>
    %337 = arith.addf %335, %336 : vector<8x128xf32>
    %338 = arith.addi %48, %c7_i32 : i32
    %c3_i32_122 = arith.constant 3 : i32
    %339 = arith.cmpi slt, %338, %c3_i32_122 : i32
    %340 = arith.select %339, %337, %304 : vector<8x128xf32>
    %c8_i32_123 = arith.constant 8 : i32
    %c0_124 = arith.constant 0 : index
    %c0_125 = arith.constant 0 : index
    %341 = vector.load %arg13[%c0_124, %c0_125] : memref<8x128xf32, #tpu.memory_space<vmem>>, vector<8x128xf32>
    tpu.vector_store %arg13[%c0_124, %c0_125], %340 {strides = array<i32>} : memref<8x128xf32, #tpu.memory_space<vmem>>, vector<8x128xf32>,
    %c0_126 = arith.constant 0 : index
    %c0_127 = arith.constant 0 : index
    %342 = vector.load %arg9[%c0_126, %c0_127] : memref<128x128xf32, #tpu.memory_space<vmem>>, vector<128x128xf32>
    %cst_128 = arith.constant dense<0.000000e+00> : vector<8x128xf32>
    %343 = tpu.matmul %340, %342, %cst_128 {dimension_numbers = #tpu.dot_dimension_numbers<[1], [0], [0], [1], [0, 0, 1, 1], [], []>} : vector<8x128xf32>, vector<128x128xf32>, vector<8x128xf32> -> vector<8x128xf32>
    %c0_129 = arith.constant 0 : index
    %c0_130 = arith.constant 0 : index
    %344 = vector.load %arg10[%c0_129, %c0_130] : memref<1x128xf32, #tpu.memory_space<vmem>>, vector<1x128xf32>
    %345 = vector.broadcast %344 : vector<1x128xf32> to vector<8x128xf32>
    %346 = arith.addf %343, %345 : vector<8x128xf32>
    %c0_131 = arith.constant 0 : index
    %c0_132 = arith.constant 0 : index
    %c0_133 = arith.constant 0 : index
    %347 = vector.load %arg11[%c0_131, %c0_132, %c0_133] : memref<1x8x128xf32, #tpu.memory_space<vmem>>, vector<1x8x128xf32>
    %348 = vector.shape_cast %347 : vector<1x8x128xf32> to vector<8x128xf32>
    %349 = vector.shape_cast %346 : vector<8x128xf32> to vector<1x8x128xf32>
    tpu.vector_store %arg11[%c0_131, %c0_132, %c0_133], %349 {strides = array<i32>} : memref<1x8x128xf32, #tpu.memory_space<vmem>>, vector<1x8x128xf32>,
    return
  }
  func.func @transform_0(%arg0: i32, %arg1: i32) -> (i32, i32, i32, i32) {
    %c0_i32 = arith.constant 0 : i32
    %c0_i32_0 = arith.constant 0 : i32
    %c0_i32_1 = arith.constant 0 : i32
    return %arg0, %arg1, %c0_i32, %c0_i32_0 : i32, i32, i32, i32
  }
  func.func @transform_1(%arg0: i32, %arg1: i32) -> (i32, i32, i32) {
    %c0_i32 = arith.constant 0 : i32
    %c0_i32_0 = arith.constant 0 : i32
    %c0_i32_1 = arith.constant 0 : i32
    %c0_i32_2 = arith.constant 0 : i32
    return %c0_i32, %c0_i32_0, %c0_i32_1 : i32, i32, i32
  }
  func.func @transform_2(%arg0: i32, %arg1: i32) -> (i32, i32) {
    %c0_i32 = arith.constant 0 : i32
    %c0_i32_0 = arith.constant 0 : i32
    %c0_i32_1 = arith.constant 0 : i32
    return %c0_i32, %c0_i32_0 : i32, i32
  }
  func.func @transform_3(%arg0: i32, %arg1: i32) -> (i32, i32) {
    %c0_i32 = arith.constant 0 : i32
    %c0_i32_0 = arith.constant 0 : i32
    %c0_i32_1 = arith.constant 0 : i32
    return %c0_i32, %c0_i32_0 : i32, i32
  }
  func.func @transform_4(%arg0: i32, %arg1: i32) -> (i32, i32) {
    %c0_i32 = arith.constant 0 : i32
    %c0_i32_0 = arith.constant 0 : i32
    %c0_i32_1 = arith.constant 0 : i32
    return %c0_i32, %c0_i32_0 : i32, i32
  }
  func.func @transform_5(%arg0: i32, %arg1: i32) -> (i32, i32) {
    %c0_i32 = arith.constant 0 : i32
    %c0_i32_0 = arith.constant 0 : i32
    %c0_i32_1 = arith.constant 0 : i32
    return %c0_i32, %c0_i32_0 : i32, i32
  }
  func.func @transform_6(%arg0: i32, %arg1: i32) -> (i32, i32) {
    %c0_i32 = arith.constant 0 : i32
    %c0_i32_0 = arith.constant 0 : i32
    %c0_i32_1 = arith.constant 0 : i32
    return %c0_i32, %c0_i32_0 : i32, i32
  }
  func.func @transform_7(%arg0: i32, %arg1: i32) -> (i32, i32) {
    %c0_i32 = arith.constant 0 : i32
    %c0_i32_0 = arith.constant 0 : i32
    %c0_i32_1 = arith.constant 0 : i32
    return %c0_i32, %c0_i32_0 : i32, i32
  }
  func.func @transform_8(%arg0: i32, %arg1: i32) -> (i32, i32) {
    %c0_i32 = arith.constant 0 : i32
    %c0_i32_0 = arith.constant 0 : i32
    %c0_i32_1 = arith.constant 0 : i32
    return %c0_i32, %c0_i32_0 : i32, i32
  }
  func.func @transform_9(%arg0: i32, %arg1: i32) -> (i32, i32, i32) {
    %c0_i32 = arith.constant 0 : i32
    %c0_i32_0 = arith.constant 0 : i32
    %c0_i32_1 = arith.constant 0 : i32
    return %arg0, %c0_i32, %c0_i32_0 : i32, i32, i32
  }
}

</mosaic_0001>

<bundles_post_ra>
// kernel: network_forward.1
= control target key start
LH: loop header
LB: loop body
LE: loop exit
PB: predicated region body
PF: predicated region fallthrough
CT: control target
= control target key end

     0   :  { %vm80_vm0 = vcmask 1045504   ;;  %vm55_vm1 = vcmask 244736   ;;  %vm4330_vm2 = vmmov 1   ;;  %vm4333_vm4 = vmmov 0   ;;  %s5369_s1 = inlined_call_operand.vmem [shape: f32[6,30,128], index: 1, kind: input, shape index: {}]   ;;  %s5370_s0 = inlined_call_operand.vmem [shape: f32[1,1,104,30], index: 0, kind: input, shape index: {}]   ;;  %s5371_s3 = inlined_call_operand.vmem [shape: f32[128,384], index: 3, kind: input, shape index: {}]   ;;  %s5372_s5 = inlined_call_operand.vmem [shape: f32[128,384], index: 5, kind: input, shape index: {}]   ;;  %s5373_s2 = inlined_call_operand.vmem [shape: f32[1,128], index: 2, kind: input, shape index: {}]   ;;  %s5374_s4 = inlined_call_operand.vmem [shape: f32[1,384], index: 4, kind: input, shape index: {}]   ;;  %s5375_s6 = inlined_call_operand.vmem [shape: f32[1,384], index: 6, kind: input, shape index: {}]   ;;  %s5376_s7 = inlined_call_operand.vmem [shape: f32[128,128], index: 7, kind: input, shape index: {}]   ;;  %s5377_s8 = inlined_call_operand.vmem [shape: f32[1,128], index: 8, kind: input, shape index: {}]   ;;  %s5378_s9 = inlined_call_operand.vmem [shape: f32[1,8,128], index: 9, kind: output, shape index: {}]  }
   0x1   :  { %v2806_v0 = vld [vmem:[%s5369_s1 + $0x20] sm:$0xff]  ;;  %v2807_v1 = vld [vmem:[%s5369_s1 + $0x28] sm:$0xff]  ;;  %v2808_v2 = vld [vmem:[%s5369_s1 + $0x30] sm:$0xff] }
   0x2   :  { %v3626_v3 = vpack.c.bf16 %v2807_v1, %v2806_v0  ;;  %v2809_v4 = vld [vmem:[%s5369_s1 + $0x38] sm:$0x3f]  ;;  %v4399_v5 = vld [vmem:[%s5370_s0 + $0x8] sm:$0xff]  ;;  %vm4401_vm3 = vmpackc.low %vm80_vm0, %vm4330_vm2 }
   0x3   :  { %v3630_v6 = vpack.c.bf16 %v2809_v4, %v2808_v2  ;;  %3155 = vmatprep.mubr.msk.f32.mxu0 %vm55_vm1, %v4399_v5  ;;  %v45_v8 = vld [vmem:[%s5369_s1] sm:$0xff]  ;;  %v46_v9 = vld [vmem:[%s5369_s1 + $0x8] sm:$0xff]  ;;  %v47_v11 = vld [vmem:[%s5369_s1 + $0x10] sm:$0xff] }
   0x4   :  { %3627 = vmatprep.subr.bf16.mxu0 %v3626_v3  ;;  %v3636_v10 = vpack.c.bf16 %v46_v9, %v45_v8  ;;  %v48_v12 = vld [vmem:[%s5369_s1 + $0x18] sm:$0x3f]  ;;  %v4426_v13 = vld [vmem:[%s5370_s0 + $0x10] sm:$0xff]  ;;  %v2828_v16 = vld [vmem:[%s5369_s1 + $0x40] sm:$0xff] }
   0x5   :  { %3629 = vmatpush3.bf16.msra.mxu0 %v3626_v3  ;;  %v4431_v14 = vld [vmem:[%s5370_s0 + $0x18] sm:$0xff]  ;;  %v3640_v15 = vpack.c.bf16 %v48_v12, %v47_v11  ;;  %v2829_v17 = vld [vmem:[%s5369_s1 + $0x48] sm:$0xff]  ;;  %v4446_v18 = vld [vmem:[%s5370_s0 + $0x20] sm:$0xff] }
   0x6   :  { %3632 = vmatprep.subr.msk.bf16.mxu0 %vm4401_vm3, %v3630_v6  ;;  %v4451_v19 = vld [vmem:[%s5370_s0 + $0x28] sm:$0xff]  ;;  %v3646_v21 = vpack.c.bf16 %v2829_v17, %v2828_v16  ;;  %v939_v22 = vld [vmem:[%s5371_s3 + $0x20] sm:$0xff]  ;;  %v938_v24 = vld [vmem:[%s5371_s3 + $0x18] sm:$0xff] }
   0x7   :  { %v936_v20 = vld [vmem:[%s5371_s3 + $0x8] sm:$0xff]  ;;  %v935_v23 = vld [vmem:[%s5371_s3] sm:$0xff]  ;;  %v942_v27 = vld [vmem:[%s5371_s3 + $0x38] sm:$0xff] }
   0x8   :  { %v3686_v25 = vpack.c.bf16 %v939_v22, %v936_v20  ;;  %v3688_v26 = vpack.c.bf16 %v938_v24, %v935_v23  ;;  %v945_v28 = vld [vmem:[%s5371_s3 + $0x50] sm:$0xff]  ;;  %v944_v31 = vld [vmem:[%s5371_s3 + $0x48] sm:$0xff]  ;;  %v951_v34 = vld [vmem:[%s5371_s3 + $0x80] sm:$0xff] }
   0x9   :  { %3635 = vmatpush3.bf16.msk.msra.mxu0 %vm4401_vm3, %v3630_v6  ;;  %v3690_v29 = vpack.c.bf16 %v945_v28, %v942_v27  ;;  %v941_v30 = vld [vmem:[%s5371_s3 + $0x30] sm:$0xff]  ;;  %v948_v33 = vld [vmem:[%s5371_s3 + $0x68] sm:$0xff]  ;;  %v4499_v35 = vld [vmem:[%s5370_s0 + $0x38] sm:$0xff] }
   0xa   :  { %3637 = vmatprep.subr.bf16.mxu0 %v3636_v10  ;;  %v4486_v32 = vld [vmem:[%s5370_s0 + $0x30] sm:$0xff]  ;;  %3687 = vmatprep.subr.bf16.mxu1 %v3686_v25  ;;  %v3692_v36 = vpack.c.bf16 %v944_v31, %v941_v30  ;;  %v3694_v37 = vpack.c.bf16 %v951_v34, %v948_v33  ;;  %v947_v38 = vld [vmem:[%s5371_s3 + $0x60] sm:$0xff]  ;;  %v950_v39 = vld [vmem:[%s5371_s3 + $0x78] sm:$0xff] }
   0xb   :  { %3689 = vmatpush1.bf16.msra.mxu1 %v3688_v26  ;;  %v4514_v40 = vld [vmem:[%s5370_s0 + $0x40] sm:$0xff]  ;;  %v954_v41 = vld [vmem:[%s5371_s3 + $0x98] sm:$0xff]  ;;  %v957_v42 = vld [vmem:[%s5371_s3 + $0xb0] sm:$0xff]  ;;  %v3696_v46 = vpack.c.bf16 %v950_v39, %v947_v38 }
   0xc   :  { %3156 = vmatmul.mubr.msk.f32.vlgmr.msra.gmra.mrb[0].mxu0 %vm55_vm1, %v4426_v13  ;;  %3691 = vmatprep.subr.bf16.mxu1 %v3690_v29  ;;  %v37_v43 = vld [vmem:[%s5370_s0] sm:$0xff]  ;;  %v2830_v44 = vld [vmem:[%s5369_s1 + $0x50] sm:$0xff]  ;;  %v2831_v45 = vld [vmem:[%s5369_s1 + $0x58] sm:$0x3f]  ;;  %v3698_v47 = vpack.c.bf16 %v957_v42, %v954_v41  ;;  %v4332_v41 = vmov 0.0|0.0  }
   0xd   :  { %3639 = vmatpush3.bf16.msra.mxu0 %v3636_v10  ;;  %3158 = vmatprep.mubr.msk.f32.mxu0 %vm55_vm1, %v4431_v14  ;;  %v953_v48 = vld [vmem:[%s5371_s3 + $0x90] sm:$0xff]  ;;  %v956_v49 = vld [vmem:[%s5371_s3 + $0xa8] sm:$0xff]  ;;  %v963_v51 = vld [vmem:[%s5371_s3 + $0xe0] sm:$0xff]  ;;  %v3650_v52 = vpack.c.bf16 %v2831_v45, %v2830_v44 }
   0xe   :  { %3642 = vmatprep.subr.msk.bf16.mxu0 %vm4401_vm3, %v3640_v15  ;;  %v960_v50 = vld [vmem:[%s5371_s3 + $0xc8] sm:$0xff]  ;;  %v2841_v53 = vld [vmem:[%s5369_s1 + $0x60] sm:$0xff]  ;;  %v3700_v55 = vpack.c.bf16 %v956_v49, %v953_v48  ;;  %v962_v58 = vld [vmem:[%s5371_s3 + $0xd8] sm:$0xff] }
   0xf   :  { %3693 = vmatpush1.bf16.msra.mxu1 %v3692_v36  ;;  %v2842_v54 = vld [vmem:[%s5369_s1 + $0x68] sm:$0xff]  ;;  %v3702_v56 = vpack.c.bf16 %v963_v51, %v960_v50  ;;  %v959_v57 = vld [vmem:[%s5371_s3 + $0xc0] sm:$0xff]  ;;  %v2843_v61 = vld [vmem:[%s5369_s1 + $0x70] sm:$0xff] }
  0x10   :  { %3159 = vmatmul.mubr.msk.f32.gmra.mrb[2].mxu0 %vm55_vm1, %v4446_v18  ;;  %3695 = vmatprep.subr.bf16.mxu1 %v3694_v37  ;;  %v3656_v59 = vpack.c.bf16 %v2842_v54, %v2841_v53  ;;  %v3704_v60 = vpack.c.bf16 %v962_v58, %v959_v57  ;;  %v2844_v62 = vld [vmem:[%s5369_s1 + $0x78] sm:$0x3f]  ;;  %v2854_v0 = vld [vmem:[%s5369_s1 + $0x80] sm:$0xff]  ;;  %v2855_v1 = vld [vmem:[%s5369_s1 + $0x88] sm:$0xff]  ;;  %v4331_v37 = vmov 0.0  }
  0x11   :  { %3161 = vmatprep.mubr.msk.f32.mxu0 %vm55_vm1, %v4451_v19  ;;  %3645 = vmatpush3.bf16.msk.msra.mxu0 %vm4401_vm3, %v3640_v15  ;;  %v3660_v63 = vpack.c.bf16 %v2844_v62, %v2843_v61  ;;  %v3666_v2 = vpack.c.bf16 %v2855_v1, %v2854_v0  ;;  %v307_v3 = vld [vmem:[%s5370_s0 + $0x48] sm:$0xff]  ;;  %v2856_v4 = vld [vmem:[%s5369_s1 + $0x90] sm:$0xff]  ;;  %v2867_v8 = vld [vmem:[%s5369_s1 + $0xa0] sm:$0xff] }
  0x12   :  { %3647 = vmatprep.subr.bf16.mxu0 %v3646_v21  ;;  %v2868_v9 = vld [vmem:[%s5369_s1 + $0xa8] sm:$0xff]  ;;  %v460_v11 = vld [vmem:[%s5370_s0 + $0x50] sm:$0xff]  ;;  %v613_v15 = vld [vmem:[%s5370_s0 + $0x58] sm:$0xff]  ;;  %1064 = vmatprep.mubr.f32.mxu1 %v4331_v37 }
  0x13   :  { %3697 = vmatpush1.bf16.msra.mxu1 %v3696_v46  ;;  %v3676_v10 = vpack.c.bf16 %v2868_v9, %v2867_v8  ;;  %v2869_v12 = vld [vmem:[%s5369_s1 + $0xb0] sm:$0xff]  ;;  %v766_v7 = vld [vmem:[%s5370_s0 + $0x60] sm:$0xff]  ;;  %v966_v16 = vld [vmem:[%s5371_s3 + $0xf8] sm:$0xff] }
  0x14   :  { %3162 = vmatmul.mubr.msk.f32.gmra.mrb[4].mxu0 %vm55_vm1, %v4486_v32  ;;  %3699 = vmatprep.subr.bf16.mxu1 %v3698_v47  ;;  %v969_v17 = vld [vmem:[%s5371_s3 + $0x110] sm:$0xff]  ;;  %v968_v20 = vld [vmem:[%s5371_s3 + $0x108] sm:$0xff]  ;;  %v975_v23 = vld [vmem:[%s5371_s3 + $0x140] sm:$0xff] }
  0x15   :  { %3164 = vmatprep.mubr.msk.f32.mxu0 %vm55_vm1, %v4499_v35  ;;  %v972_v22 = vld [vmem:[%s5371_s3 + $0x128] sm:$0xff]  ;;  %v971_v25 = vld [vmem:[%s5371_s3 + $0x120] sm:$0xff]  ;;  %v974_v26 = vld [vmem:[%s5371_s3 + $0x138] sm:$0xff] }
  0x16   :  { %v3710_v24 = vpack.c.bf16 %v975_v23, %v972_v22  ;;  %v3712_v27 = vpack.c.bf16 %v974_v26, %v971_v25  ;;  %v978_v28 = vld [vmem:[%s5371_s3 + $0x158] sm:$0xff]  ;;  %v981_v29 = vld [vmem:[%s5371_s3 + $0x170] sm:$0xff]  ;;  %v1272_v39 = vld [vmem:[%s5372_s5 + $0x28] sm:$0xff] }
  0x17   :  { %3701 = vmatpush1.bf16.msra.mxu1 %v3700_v55  ;;  %v3714_v30 = vpack.c.bf16 %v981_v29, %v978_v28  ;;  %v977_v31 = vld [vmem:[%s5371_s3 + $0x150] sm:$0xff]  ;;  %v1275_v42 = vld [vmem:[%s5372_s5 + $0x40] sm:$0xff]  ;;  %v1284_v46 = vld [vmem:[%s5372_s5 + $0x88] sm:$0xff] }
  0x18   :  { %3165 = vmatmul.mubr.msk.f32.gmra.mrb[6].mxu0 %vm55_vm1, %v4514_v40  ;;  %3703 = vmatprep.subr.bf16.mxu1 %v3702_v56  ;;  %v937_v34 = vld [vmem:[%s5371_s3 + $0x10] sm:$0xff]  ;;  %v1287_v48 = vld [vmem:[%s5372_s5 + $0xa0] sm:$0xff]  ;;  %v1290_v49 = vld [vmem:[%s5372_s5 + $0xb8] sm:$0xff] }
  0x19   :  { %3175 = vmatprep.mubr.msk.f32.mxu0 %vm55_vm1, %v37_v43  ;;  %v1269_v38 = vld [vmem:[%s5372_s5 + $0x10] sm:$0xff]  ;;  %v1278_v43 = vld [vmem:[%s5372_s5 + $0x58] sm:$0xff]  ;;  %v4768_v50 = vpack.c.bf16 %v1290_v49, %v1287_v48  ;;  %v1299_v54 = vld [vmem:[%s5372_s5 + $0x100] sm:$0xff] }
  0x1a   :  { %v4747_v44 = vpack.c.bf16 %v1278_v43, %v1275_v42  ;;  %v1281_v45 = vld [vmem:[%s5372_s5 + $0x70] sm:$0xff]  ;;  %v1302_v55 = vld [vmem:[%s5372_s5 + $0x118] sm:$0xff]  ;;  %v1308_v58 = vld [vmem:[%s5372_s5 + $0x148] sm:$0xff] }
  0x1b   :  { %3705 = vmatpush1.bf16.msra.mxu1 %v3704_v60  ;;  %v4757_v47 = vpack.c.bf16 %v1284_v46, %v1281_v45  ;;  %v1293_v51 = vld [vmem:[%s5372_s5 + $0xd0] sm:$0xff]  ;;  %v4788_v56 = vpack.c.bf16 %v1302_v55, %v1299_v54  ;;  %v1311_v60 = vld [vmem:[%s5372_s5 + $0x160] sm:$0xff]  ;;  %v1314_v61 = vld [vmem:[%s5372_s5 + $0x178] sm:$0xff] }
  0x1c   :  { %3176 = vmatmul.mubr.msk.f32.vlgmr.msra.gmra.mrb[0].mxu0 %vm55_vm1, %v4399_v5  ;;  %v2857_v5 = vld [vmem:[%s5369_s1 + $0x98] sm:$0x3f]  ;;  %v1305_v57 = vld [vmem:[%s5372_s5 + $0x130] sm:$0xff]  ;;  %v4808_v62 = vpack.c.bf16 %v1314_v61, %v1311_v60  ;;  %v979_v43 = vld [vmem:[%s5371_s3 + $0x160] sm:$0xff] }
  0x1d   :  { %3649 = vmatpush3.bf16.msra.mxu0 %v3646_v21  ;;  %3178 = vmatprep.mubr.msk.f32.mxu0 %vm55_vm1, %v4426_v13  ;;  %v3670_v6 = vpack.c.bf16 %v2857_v5, %v2856_v4  ;;  %v958_v22 = vld [vmem:[%s5371_s3 + $0xb8] sm:$0xff]  ;;  %v961_v26 = vld [vmem:[%s5371_s3 + $0xd0] sm:$0xff]  ;;  %v1268_v49 = vld [vmem:[%s5372_s5 + $0x8] sm:$0xff] }
  0x1e   :  { %3652 = vmatprep.subr.msk.bf16.mxu0 %vm4401_vm3, %v3650_v52  ;;  %v982_v45 = vld [vmem:[%s5371_s3 + $0x178] sm:$0xff]  ;;  %v1267_v54 = vld [vmem:[%s5372_s5] sm:$0xff]  ;;  %v1277_v60 = vld [vmem:[%s5372_s5 + $0x50] sm:$0xff] }
  0x1f   :  { %v3746_v46 = vpack.c.bf16 %v982_v45, %v979_v43  ;;  %v1270_v55 = vld [vmem:[%s5372_s5 + $0x18] sm:$0xff] }
  0x20   :  { %3179 = vmatmul.mubr.msk.f32.gmra.mrb[2].mxu0 %vm55_vm1, %v4431_v14  ;;  %v4912_v61 = vpack.c.bf16 %v1270_v55, %v1267_v54 }
  0x21   :  { %3181 = vmatprep.mubr.msk.f32.mxu0 %vm55_vm1, %v4446_v18  ;;  %3655 = vmatpush3.bf16.msk.msra.mxu0 %vm4401_vm3, %v3650_v52  ;;  %v1296_v52 = vld [vmem:[%s5372_s5 + $0xe8] sm:$0xff] }
  0x22   :  { %3657 = vmatprep.subr.bf16.mxu0 %v3656_v59  ;;  %v4778_v53 = vpack.c.bf16 %v1296_v52, %v1293_v51  ;;  %v1271_v51 = vld [vmem:[%s5372_s5 + $0x20] sm:$0xff] }
  0x23   :  { %v4897_v52 = vpack.c.bf16 %v1271_v51, %v1268_v49  ;;  %v985_v51 = vlaneseq }
  0x24   :  { %3182 = vmatmul.mubr.msk.f32.gmra.mrb[4].mxu0 %vm55_vm1, %v4451_v19 }
  0x25   :  { %3184 = vmatprep.mubr.msk.f32.mxu0 %vm55_vm1, %v4486_v32 }
  0x28   :  { %3185 = vmatmul.mubr.msk.f32.gmra.mrb[6].mxu0 %vm55_vm1, %v4499_v35 }
  0x29   :  { %3195 = vmatprep.mubr.msk.f32.mxu0 %vm55_vm1, %v4426_v13  ;;  %v2870_v13 = vld [vmem:[%s5369_s1 + $0xb8] sm:$0x3f] }
  0x2c   :  { %3196 = vmatmul.mubr.msk.f32.vlgmr.msra.gmra.mrb[0].mxu0 %vm55_vm1, %v4431_v14 }
  0x2d   :  { %3659 = vmatpush3.bf16.msra.mxu0 %v3656_v59  ;;  %3198 = vmatprep.mubr.msk.f32.mxu0 %vm55_vm1, %v4446_v18  ;;  %v4798_v59 = vpack.c.bf16 %v1308_v58, %v1305_v57  ;;  %v1274_v58 = vld [vmem:[%s5372_s5 + $0x38] sm:$0xff] }
  0x2e   :  { %3662 = vmatprep.subr.msk.bf16.mxu0 %vm4401_vm3, %v3660_v63 }
  0x30   :  { %3199 = vmatmul.mubr.msk.f32.gmra.mrb[2].mxu0 %vm55_vm1, %v4451_v19 }
  0x31   :  { %3201 = vmatprep.mubr.msk.f32.mxu0 %vm55_vm1, %v4486_v32  ;;  %3665 = vmatpush3.bf16.msk.msra.mxu0 %vm4401_vm3, %v3660_v63  ;;  %v2880_v63 = vld [vmem:[%s5373_s2] ss:$0 sm:$0xff] }
  0x32   :  { %3667 = vmatprep.subr.bf16.mxu0 %v3666_v2 }
  0x34   :  { %3202 = vmatmul.mubr.msk.f32.gmra.mrb[4].mxu0 %vm55_vm1, %v4499_v35 }
  0x35   :  { %3204 = vmatprep.mubr.msk.f32.mxu0 %vm55_vm1, %v4514_v40 }
  0x38   :  { %3205 = vmatmul.mubr.msk.f32.gmra.mrb[6].mxu0 %vm55_vm1, %v307_v3 }
  0x39   :  { %3215 = vmatprep.mubr.msk.f32.mxu0 %vm55_vm1, %v4431_v14  ;;  %v3680_v14 = vpack.c.bf16 %v2870_v13, %v2869_v12 }
  0x3c   :  { %3216 = vmatmul.mubr.msk.f32.vlgmr.msra.gmra.mrb[0].mxu0 %vm55_vm1, %v4446_v18 }
  0x3d   :  { %3669 = vmatpush3.bf16.msra.mxu0 %v3666_v2  ;;  %3218 = vmatprep.mubr.msk.f32.mxu0 %vm55_vm1, %v4451_v19 }
  0x3e   :  { %3672 = vmatprep.subr.msk.bf16.mxu0 %vm4401_vm3, %v3670_v6 }
  0x40   :  { %3219 = vmatmul.mubr.msk.f32.gmra.mrb[2].mxu0 %vm55_vm1, %v4486_v32 }
  0x41   :  { %3221 = vmatprep.mubr.msk.f32.mxu0 %vm55_vm1, %v4499_v35  ;;  %3675 = vmatpush3.bf16.msk.msra.mxu0 %vm4401_vm3, %v3670_v6 }
  0x42   :  { %3677 = vmatprep.subr.bf16.mxu0 %v3676_v10 }
  0x44   :  { %3222 = vmatmul.mubr.msk.f32.gmra.mrb[4].mxu0 %vm55_vm1, %v4514_v40 }
  0x45   :  { %3224 = vmatprep.mubr.msk.f32.mxu0 %vm55_vm1, %v307_v3 }
  0x48   :  { %3225 = vmatmul.mubr.msk.f32.gmra.mrb[6].mxu0 %vm55_vm1, %v460_v11 }
  0x49   :  { %3235 = vmatprep.mubr.msk.f32.mxu0 %vm55_vm1, %v4446_v18  ;;  %v3706_v18 = vpack.c.bf16 %v969_v17, %v966_v16  ;;  %v949_v16 = vld [vmem:[%s5371_s3 + $0x70] sm:$0xff]  ;;  %v952_v17 = vld [vmem:[%s5371_s3 + $0x88] sm:$0xff] }
  0x4b   :  { %3707 = vmatprep.subr.bf16.mxu1 %v3706_v18 }
  0x4c   :  { %3236 = vmatmul.mubr.msk.f32.vlgmr.msra.gmra.mrb[0].mxu0 %vm55_vm1, %v4451_v19 }
  0x4d   :  { %3679 = vmatpush3.bf16.msra.mxu0 %v3676_v10  ;;  %3238 = vmatprep.mubr.msk.f32.mxu0 %vm55_vm1, %v4486_v32  ;;  %v943_v10 = vld [vmem:[%s5371_s3 + $0x40] sm:$0xff] }
  0x4e   :  { %3682 = vmatprep.subr.msk.bf16.mxu0 %vm4401_vm3, %v3680_v14 }
  0x50   :  { %3239 = vmatmul.mubr.msk.f32.gmra.mrb[2].mxu0 %vm55_vm1, %v4499_v35 }
  0x51   :  { %3241 = vmatprep.mubr.msk.f32.mxu0 %vm55_vm1, %v4514_v40  ;;  %3685 = vmatpush3.bf16.msk.msra.mxu0 %vm4401_vm3, %v3680_v14 }
  0x52   :  { %3782 = vmatprep.subr.bf16.mxu0 %v4332_v41 }
  0x54   :  { %3242 = vmatmul.mubr.msk.f32.gmra.mrb[4].mxu0 %vm55_vm1, %v307_v3 }
  0x55   :  { %3244 = vmatprep.mubr.msk.f32.mxu0 %vm55_vm1, %v460_v11 }
  0x58   :  { %3245 = vmatmul.mubr.msk.f32.gmra.mrb[6].mxu0 %vm55_vm1, %v613_v15 }
  0x59   :  { %3255 = vmatprep.mubr.msk.f32.mxu0 %vm55_vm1, %v4451_v19  ;;  %v965_v19 = vld [vmem:[%s5371_s3 + $0xf0] sm:$0xff] }
  0x5a   :  { %v3708_v21 = vpack.c.bf16 %v968_v20, %v965_v19  ;;  %v3726_v19 = vpack.c.bf16 %v952_v17, %v949_v16 }
  0x5c   :  { %3256 = vmatmul.mubr.msk.f32.vlgmr.msra.gmra.mrb[0].mxu0 %vm55_vm1, %v4486_v32  ;;  %3709 = vmatpush1.bf16.msra.mxu1 %v3708_v21  ;;  %v980_v32 = vld [vmem:[%s5371_s3 + $0x168] sm:$0xff]  ;;  %v955_v21 = vld [vmem:[%s5371_s3 + $0xa0] sm:$0xff] }
  0x5d   :  { %3258 = vmatprep.mubr.msk.f32.mxu0 %vm55_vm1, %v4499_v35  ;;  %3711 = vmatprep.subr.bf16.mxu1 %v3710_v24  ;;  %v3716_v33 = vpack.c.bf16 %v980_v32, %v977_v31  ;;  %v940_v35 = vld [vmem:[%s5371_s3 + $0x28] sm:$0xff]  ;;  %v3730_v24 = vpack.c.bf16 %v958_v22, %v955_v21  ;;  %v967_v31 = vld [vmem:[%s5371_s3 + $0x100] sm:$0xff]  ;;  %v970_v32 = vld [vmem:[%s5371_s3 + $0x118] sm:$0xff] }
  0x5e   :  { %v4726_v36 = vpack.c.bf16 %v940_v35, %v937_v34  ;;  %v3738_v34 = vpack.c.bf16 %v970_v32, %v967_v31  ;;  %v1301_v21 = vld [vmem:[%s5372_s5 + $0x110] sm:$0xff]  ;;  %v1306_v31 = vld [vmem:[%s5372_s5 + $0x138] sm:$0xff] }
  0x5f   :  { %v1310_v32 = vld [vmem:[%s5372_s5 + $0x158] sm:$0xff] }
  0x60   :  { %3259 = vmatmul.mubr.msk.f32.gmra.mrb[2].mxu0 %vm55_vm1, %v4514_v40  ;;  %3713 = vmatpush1.bf16.msra.mxu1 %v3712_v27  ;;  %v4736_v40 = vpack.c.bf16 %v1272_v39, %v1269_v38  ;;  %v964_v27 = vld [vmem:[%s5371_s3 + $0xe8] sm:$0xff] }
  0x61   :  { %3261 = vmatprep.mubr.msk.f32.mxu0 %vm55_vm1, %v307_v3  ;;  %3715 = vmatprep.subr.bf16.mxu1 %v3714_v30  ;;  %v3734_v29 = vpack.c.bf16 %v964_v27, %v961_v26  ;;  %v976_v38 = vld [vmem:[%s5371_s3 + $0x148] sm:$0xff]  ;;  %v1307_v27 = vld [vmem:[%s5372_s5 + $0x140] sm:$0xff] }
  0x62   :  { %3784 = vmatpush3.bf16.msra.mxu0 %v4736_v40  ;;  %v1304_v26 = vld [vmem:[%s5372_s5 + $0x128] sm:$0xff] }
  0x63   :  { %3785 = vmatprep.subr.bf16.mxu0 %v4332_v41 }
  0x64   :  { %3262 = vmatmul.mubr.msk.f32.gmra.mrb[4].mxu0 %vm55_vm1, %v460_v11  ;;  %3717 = vmatpush1.bf16.msra.mxu1 %v3716_v33  ;;  %v946_v11 = vld [vmem:[%s5371_s3 + $0x58] sm:$0xff] }
  0x65   :  { %3264 = vmatprep.mubr.msk.f32.mxu0 %vm55_vm1, %v613_v15  ;;  %3719 = vmatprep.subr.bf16.mxu1 %v4726_v36  ;;  %v3722_v15 = vpack.c.bf16 %v946_v11, %v943_v10  ;;  %v1289_v10 = vld [vmem:[%s5372_s5 + $0xb0] sm:$0xff] }
  0x66   :  { %3787 = vmatpush3.bf16.msra.mxu0 %v4747_v44 }
  0x67   :  { %3788 = vmatprep.subr.bf16.mxu0 %v4332_v41 }
  0x68   :  { %3265 = vmatmul.mubr.msk.f32.gmra.mrb[6].mxu0 %vm55_vm1, %v766_v7 }
  0x69   :  { %3343 = vmatprep.mubr.msk.f32.mxu0 %vm4333_vm4, %v4331_v37 }
  0x6a   :  { %3790 = vmatpush3.bf16.msra.mxu0 %v4757_v47 }
  0x6b   :  { %3791 = vmatprep.subr.bf16.mxu0 %v4332_v41 }
  0x6e   :  { %3793 = vmatpush3.bf16.msra.mxu0 %v4768_v50 }
  0x6f   :  { %3794 = vmatprep.subr.bf16.mxu0 %v4332_v41 }
  0x72   :  { %3796 = vmatpush3.bf16.msra.mxu0 %v4778_v53 }
  0x73   :  { %3797 = vmatprep.subr.bf16.mxu0 %v4332_v41 }
  0x76   :  { %3799 = vmatpush3.bf16.msra.mxu0 %v4788_v56 }
  0x77   :  { %3800 = vmatprep.subr.bf16.mxu0 %v4332_v41 }
  0x7a   :  { %3802 = vmatpush3.bf16.msra.mxu0 %v4798_v59 }
  0x7b   :  { %3803 = vmatprep.subr.bf16.mxu0 %v4332_v41 }
  0x7e   :  { %3805 = vmatpush3.bf16.msra.mxu0 %v4808_v62 }
  0x7f   :  { %3838 = vmatprep.subr.bf16.mxu0 %v4332_v41 }
  0x81   :  { %3344 = vmatmul.mubr.f32.vlgmr.msra.gmra.mrb[8].mxu0 %v4331_v37 }
  0x82   :  { %3840 = vmatpush3.bf16.msra.mxu0 %v4736_v40  ;;  %3378 = vmatprep.mubr.msk.f32.mxu0 %vm4333_vm4, %v4331_v37 }
  0x83   :  { %3841 = vmatprep.subr.bf16.mxu0 %v4332_v41 }
  0x86   :  { %3843 = vmatpush3.bf16.msra.mxu0 %v4747_v44 }
  0x87   :  { %3844 = vmatprep.subr.bf16.mxu0 %v4332_v41 }
  0x8a   :  { %3846 = vmatpush3.bf16.msra.mxu0 %v4757_v47 }
  0x8b   :  { %3847 = vmatprep.subr.bf16.mxu0 %v4332_v41 }
  0x8e   :  { %3849 = vmatpush3.bf16.msra.mxu0 %v4768_v50 }
  0x8f   :  { %3850 = vmatprep.subr.bf16.mxu0 %v4332_v41 }
  0x92   :  { %3852 = vmatpush3.bf16.msra.mxu0 %v4778_v53 }
  0x93   :  { %3853 = vmatprep.subr.bf16.mxu0 %v4332_v41 }
  0x96   :  { %3855 = vmatpush3.bf16.msra.mxu0 %v4788_v56 }
  0x97   :  { %3856 = vmatprep.subr.bf16.mxu0 %v4332_v41 }
  0x9a   :  { %3858 = vmatpush3.bf16.msra.mxu0 %v4798_v59 }
  0x9b   :  { %3859 = vmatprep.subr.bf16.mxu0 %v4332_v41 }
  0x9e   :  { %3861 = vmatpush3.bf16.msra.mxu0 %v4808_v62 }
  0x9f   :  { %3894 = vmatprep.subr.bf16.mxu0 %v4332_v41 }
 0x12f   :  { %v3257_v0 = vpop.f32.mrb[0].mxu0 }
 0x130   :  { %v865_v1 = vpop.f32.mrb[1].mxu0  ;;  %v920_v3 = vadd.f32 %v3257_v0, %v2880_v63  ;;  %v1273_v0 = vld [vmem:[%s5372_s5 + $0x30] sm:$0xff] }
 0x131   :  { %v919_v2 = vadd.f32 %v2880_v63, %v865_v1  ;;  %v1276_v1 = vld [vmem:[%s5372_s5 + $0x48] sm:$0xff] }
 0x133   :  { %4284 = vtanh.f32 %v919_v2  ;;  %v3260_v4 = vpop.f32.mrb[2].mxu0  ;;  %v1280_v2 = vld [vmem:[%s5372_s5 + $0x68] sm:$0xff] }
 0x134   :  { %v875_v5 = vpop.f32.mrb[3].mxu0  ;;  %4286 = vtanh.f32 %v920_v3  ;;  %v922_v12 = vadd.f32 %v3260_v4, %v2880_v63  ;;  %v1283_v3 = vld [vmem:[%s5372_s5 + $0x80] sm:$0xff]  ;;  %v4931_v4 = vpack.c.bf16 %v1276_v1, %v1273_v0 }
 0x135   :  { %v921_v6 = vadd.f32 %v2880_v63, %v875_v5  ;;  %v4934_v5 = vpack.c.bf16 %v1283_v3, %v1280_v2  ;;  %v983_v1 = vld [vmem:[%s5374_s4] sm:$0x7] }
 0x137   :  { %v3263_v8 = vpop.f32.mrb[4].mxu0  ;;  %4288 = vtanh.f32 %v921_v6  ;;  %v1279_v6 = vld [vmem:[%s5372_s5 + $0x60] sm:$0xff] }
 0x138   :  { %v885_v9 = vpop.f32.mrb[5].mxu0  ;;  %4290 = vtanh.f32 %v922_v12  ;;  %v924_v23 = vadd.f32 %v3263_v8, %v2880_v63  ;;  %v1282_v8 = vld [vmem:[%s5372_s5 + $0x78] sm:$0xff] }
 0x139   :  { %v923_v18 = vadd.f32 %v2880_v63, %v885_v9  ;;  %v1286_v9 = vld [vmem:[%s5372_s5 + $0x98] sm:$0xff]  ;;  %v4949_v11 = vpack.c.bf16 %v1282_v8, %v1279_v6 }
 0x13a   :  { %v4952_v12 = vpack.c.bf16 %v1289_v10, %v1286_v9 }
 0x13b   :  { %v3266_v13 = vpop.f32.mrb[6].mxu0  ;;  %4292 = vtanh.f32 %v923_v18  ;;  %v1291_v18 = vld [vmem:[%s5372_s5 + $0xc0] sm:$0xff] }
 0x13c   :  { %v895_v14 = vpop.f32.mrb[7].mxu0  ;;  %4294 = vtanh.f32 %v924_v23  ;;  %v926_v33 = vadd.f32 %v3266_v13, %v2880_v63  ;;  %v1285_v13 = vld [vmem:[%s5372_s5 + $0x90] sm:$0xff] }
 0x13d   :  { %v4841_v7 = vpop.eup %4284  ;;  %v925_v28 = vadd.f32 %v2880_v63, %v895_v14  ;;  %v4915_v63 = vpack.c.bf16 %v1277_v60, %v1274_v58  ;;  %v1288_v14 = vld [vmem:[%s5372_s5 + $0xa8] sm:$0xff] }
 0x13e   :  { %1065 = vmatmul.mubr.f32.vlgmr.msra.gmra.mrb[0].mxu1 %v4841_v7  ;;  %v4852_v20 = vpop.eup %4286  ;;  %v4967_v16 = vpack.c.bf16 %v1288_v14, %v1285_v13 }
 0x13f   :  { %3721 = vmatpush3.bf16.msra.mxu1 %v4726_v36  ;;  %1070 = vmatprep.mubr.f32.mxu1 %v4331_v37  ;;  %4296 = vtanh.f32 %v925_v28  ;;  %v973_v36 = vld [vmem:[%s5371_s3 + $0x130] sm:$0xff] }
 0x140   :  { %3723 = vmatprep.subr.bf16.mxu1 %v3722_v15  ;;  %4298 = vtanh.f32 %v926_v33  ;;  %v3742_v39 = vpack.c.bf16 %v976_v38, %v973_v36  ;;  %v1313_v33 = vld [vmem:[%s5372_s5 + $0x170] sm:$0xff]  ;;  %v1312_v38 = vld [vmem:[%s5372_s5 + $0x168] sm:$0xff] }
 0x141   :  { %v4289_v25 = vpop.eup %4288  ;;  %v1309_v36 = vld [vmem:[%s5372_s5 + $0x150] sm:$0xff] }
 0x142   :  { %1071 = vmatmul.mubr.f32.gmra.mrb[2].mxu1 %v4852_v20  ;;  %v4291_v30 = vpop.eup %4290 }
 0x143   :  { %3725 = vmatpush3.bf16.msra.mxu1 %v3722_v15  ;;  %1076 = vmatprep.mubr.f32.mxu1 %v4331_v37  ;;  %v1292_v15 = vld [vmem:[%s5372_s5 + $0xc8] sm:$0xff] }
 0x144   :  { %3727 = vmatprep.subr.bf16.mxu1 %v3726_v19 }
 0x145   :  { %v4293_v35 = vpop.eup %4292 }
 0x146   :  { %1077 = vmatmul.mubr.f32.gmra.mrb[4].mxu1 %v4289_v25  ;;  %v4295_v42 = vpop.eup %4294 }
 0x147   :  { %3729 = vmatpush3.bf16.msra.mxu1 %v3726_v19  ;;  %1082 = vmatprep.mubr.f32.mxu1 %v4331_v37  ;;  %v1294_v19 = vld [vmem:[%s5372_s5 + $0xd8] sm:$0xff] }
 0x148   :  { %3731 = vmatprep.subr.bf16.mxu1 %v3730_v24  ;;  %v4985_v22 = vpack.c.bf16 %v1294_v19, %v1291_v18 }
 0x149   :  { %v4297_v48 = vpop.eup %4296 }
 0x14a   :  { %1083 = vmatmul.mubr.f32.gmra.mrb[6].mxu1 %v4291_v30  ;;  %v4299_v57 = vpop.eup %4298 }
 0x14b   :  { %3733 = vmatpush3.bf16.msra.mxu1 %v3730_v24  ;;  %1088 = vmatprep.mubr.f32.mxu1 %v4331_v37  ;;  %v1297_v24 = vld [vmem:[%s5372_s5 + $0xf0] sm:$0xff] }
 0x14c   :  { %3735 = vmatprep.subr.bf16.mxu1 %v3734_v29 }
 0x14e   :  { %1089 = vmatmul.mubr.f32.gmra.mrb[8].mxu1 %v4293_v35 }
 0x14f   :  { %3737 = vmatpush3.bf16.msra.mxu1 %v3734_v29  ;;  %1094 = vmatprep.mubr.f32.mxu1 %v4331_v37  ;;  %v5007_v29 = vpack.c.bf16 %v1307_v27, %v1304_v26 }
 0x150   :  { %3739 = vmatprep.subr.bf16.mxu1 %v3738_v34 }
 0x152   :  { %1095 = vmatmul.mubr.f32.gmra.mrb[10].mxu1 %v4295_v42 }
 0x153   :  { %3741 = vmatpush3.bf16.msra.mxu1 %v3738_v34  ;;  %1100 = vmatprep.mubr.f32.mxu1 %v4331_v37 }
 0x154   :  { %3743 = vmatprep.subr.bf16.mxu1 %v3742_v39 }
 0x156   :  { %1101 = vmatmul.mubr.f32.gmra.mrb[12].mxu1 %v4297_v48 }
 0x157   :  { %3745 = vmatpush3.bf16.msra.mxu1 %v3742_v39  ;;  %1106 = vmatprep.mubr.f32.mxu1 %v4331_v37  ;;  %v5034_v39 = vpack.c.bf16 %v1312_v38, %v1309_v36 }
 0x158   :  { %3747 = vmatprep.subr.bf16.mxu1 %v3746_v46 }
 0x15a   :  { %1107 = vmatmul.mubr.f32.gmra.mrb[14].mxu1 %v4299_v57 }
 0x15b   :  { %3749 = vmatpush3.bf16.msra.mxu1 %v3746_v46  ;;  %3299 = vmatprep.mubr.f32.mxu1 %v4841_v7  ;;  %v1295_v7 = vld [vmem:[%s5372_s5 + $0xe0] sm:$0xff] }
 0x15c   :  { %3751 = vmatprep.subr.bf16.mxu1 %v4897_v52  ;;  %v4970_v17 = vpack.c.bf16 %v1295_v7, %v1292_v15 }
 0x15e   :  { %3300 = vmatmul.mubr.f32.vlgmr.msra.gmra.mrb[16].mxu1 %v4852_v20  ;;  %v1298_v20 = vld [vmem:[%s5372_s5 + $0xf8] sm:$0xff] }
 0x15f   :  { %3753 = vmatpush1.bf16.msra.mxu1 %v4912_v61  ;;  %3302 = vmatprep.mubr.f32.mxu1 %v4289_v25  ;;  %v4989_v23 = vpack.c.bf16 %v1301_v21, %v1298_v20  ;;  %v1300_v25 = vld [vmem:[%s5372_s5 + $0x108] sm:$0xff] }
 0x160   :  { %3755 = vmatprep.subr.bf16.mxu1 %v4915_v63  ;;  %v5004_v28 = vpack.c.bf16 %v1300_v25, %v1297_v24  ;;  %v1243_v24 = vld [vmem:[%s5375_s6] sm:$0x7] }
 0x162   :  { %3303 = vmatmul.mubr.f32.gmra.mrb[18].mxu1 %v4291_v30  ;;  %v1303_v30 = vld [vmem:[%s5372_s5 + $0x120] sm:$0xff] }
 0x163   :  { %3757 = vmatpush1.bf16.msra.mxu1 %v4931_v4  ;;  %3305 = vmatprep.mubr.f32.mxu1 %v4293_v35  ;;  %v5022_v34 = vpack.c.bf16 %v1306_v31, %v1303_v30  ;;  %v5025_v35 = vpack.c.bf16 %v1313_v33, %v1310_v32 }
 0x164   :  { %3759 = vmatprep.subr.bf16.mxu1 %v4934_v5 }
 0x166   :  { %3306 = vmatmul.mubr.f32.gmra.mrb[20].mxu1 %v4295_v42  ;;  %v1452_v42 = vpop.f32.mrb[8].mxu0 }
 0x167   :  { %3761 = vmatpush1.bf16.msra.mxu1 %v4949_v11  ;;  %3308 = vmatprep.mubr.f32.mxu1 %v4297_v48  ;;  %v3345_v43 = vpop.f32.mrb[9].mxu0 }
 0x168   :  { %3763 = vmatprep.subr.bf16.mxu1 %v4952_v12 }
 0x16a   :  { %3309 = vmatmul.mubr.f32.gmra.mrb[22].mxu1 %v4299_v57  ;;  %v986_v57 = vshrl.u32 %v985_v51, 7 }
 0x16b   :  { %3765 = vmatpush1.bf16.msra.mxu1 %v4967_v16  ;;  %1379 = vmatprep.mubr.f32.mxu1 %v4331_v37 }
 0x16c   :  { %3767 = vmatprep.subr.bf16.mxu1 %v4970_v17  ;;  %v995_v0 = vsub.s32 2, %v986_v57  ;;  %v987_v21 = vsub.s32 0, %v986_v57  ;;  %v991_v25 = vsub.s32 1, %v986_v57 }
 0x16e   :  { %v996_v6 = vrot.slane %v983_v1, %v995_v0  ;;  %v988_v26 = vrot.slane %v983_v1, %v987_v21  ;;  %v1248_v27 = vrot.slane %v1243_v24, %v987_v21  ;;  %v992_v30 = vrot.slane %v983_v1, %v991_v25 }
 0x16f   :  { %3769 = vmatpush1.bf16.msra.mxu1 %v4985_v22  ;;  %v1252_v31 = vrot.slane %v1243_v24, %v991_v25 }
 0x170   :  { %3771 = vmatprep.subr.bf16.mxu1 %v4989_v23  ;;  %v5067_v32 = vadd.f32 %v1248_v27, %v988_v26 }
 0x171   :  { %v5069_v36 = vadd.f32 %v1252_v31, %v992_v30 }
 0x173   :  { %3773 = vmatpush1.bf16.msra.mxu1 %v5004_v28 }
 0x174   :  { %3775 = vmatprep.subr.bf16.mxu1 %v5007_v29 }
 0x177   :  { %3777 = vmatpush1.bf16.msra.mxu1 %v5022_v34 }
 0x178   :  { %3779 = vmatprep.subr.bf16.mxu1 %v5025_v35 }
 0x17b   :  { %3781 = vmatpush1.bf16.msra.mxu1 %v5034_v39 }
 0x17c   :  { %3807 = vmatprep.subr.bf16.mxu1 %v4897_v52 }
 0x17e   :  { %1380 = vmatmul.mubr.f32.vlgmr.msra.gmra.mrb[0].mxu1 %v4331_v37 }
 0x17f   :  { %3809 = vmatpush1.bf16.msra.mxu1 %v4912_v61  ;;  %1552 = vmatprep.mubr.f32.mxu1 %v4331_v37 }
 0x180   :  { %3811 = vmatprep.subr.bf16.mxu1 %v4915_v63 }
 0x183   :  { %3813 = vmatpush1.bf16.msra.mxu1 %v4931_v4 }
 0x184   :  { %3815 = vmatprep.subr.bf16.mxu1 %v4934_v5 }
 0x187   :  { %3817 = vmatpush1.bf16.msra.mxu1 %v4949_v11 }
 0x188   :  { %3819 = vmatprep.subr.bf16.mxu1 %v4952_v12 }
 0x18b   :  { %3821 = vmatpush1.bf16.msra.mxu1 %v4967_v16 }
 0x18c   :  { %3823 = vmatprep.subr.bf16.mxu1 %v4970_v17 }
 0x18f   :  { %3825 = vmatpush1.bf16.msra.mxu1 %v4985_v22 }
 0x190   :  { %3827 = vmatprep.subr.bf16.mxu1 %v4989_v23 }
 0x193   :  { %3829 = vmatpush1.bf16.msra.mxu1 %v5004_v28 }
 0x194   :  { %3831 = vmatprep.subr.bf16.mxu1 %v5007_v29 }
 0x197   :  { %3833 = vmatpush1.bf16.msra.mxu1 %v5022_v34 }
 0x198   :  { %3835 = vmatprep.subr.bf16.mxu1 %v5025_v35 }
 0x19b   :  { %3837 = vmatpush1.bf16.msra.mxu1 %v5034_v39 }
 0x19c   :  { %3863 = vmatprep.subr.bf16.mxu1 %v4897_v52 }
 0x21d   :  { %v1084_v45 = vpop.f32.mrb[6].mxu1 }
 0x21e   :  { %v1086_v46 = vpop.f32.mrb[7].mxu1 }
 0x221   :  { %v1090_v48 = vpop.f32.mrb[8].mxu1 }
 0x222   :  { %v1092_v49 = vpop.f32.mrb[9].mxu1 }
 0x225   :  { %v1096_v54 = vpop.f32.mrb[10].mxu1 }
 0x226   :  { %v1098_v55 = vpop.f32.mrb[11].mxu1  ;;  %v5073_v54 = vrot.slane %v1243_v24, %v995_v0 }
 0x229   :  { %v1102_v58 = vpop.f32.mrb[12].mxu1 }
 0x22a   :  { %v1104_v60 = vpop.f32.mrb[13].mxu1  ;;  %v1453_v58 = vadd.f32 %v1452_v42, %v5073_v54 }
 0x22d   :  { %v1108_v2 = vpop.f32.mrb[14].mxu1 }
 0x22e   :  { %v1110_v3 = vpop.f32.mrb[15].mxu1 }
 0x231   :  { %v3301_v8 = vpop.f32.mrb[16].mxu1 }
 0x232   :  { %v5060_v9 = vadd.f32 %v3301_v8, %v996_v6  ;;  %v1179_v10 = vpop.f32.mrb[17].mxu1 }
 0x233   :  { %v1180_v1 = vadd.f32 %v1179_v10, %v996_v6 }
 0x235   :  { %v3304_v13 = vpop.f32.mrb[18].mxu1 }
 0x236   :  { %v1189_v14 = vpop.f32.mrb[19].mxu1 }
 0x237   :  { %v5062_v15 = vadd.f32 %v1189_v14, %v996_v6 }
 0x239   :  { %v3307_v7 = vpop.f32.mrb[20].mxu1 }
 0x23a   :  { %v1199_v18 = vpop.f32.mrb[21].mxu1 }
 0x23d   :  { %v3310_v19 = vpop.f32.mrb[22].mxu1 }
 0x23e   :  { %v1209_v20 = vpop.f32.mrb[23].mxu1 }
 0x251   :  { %v1381_v33 = vpop.f32.mrb[0].mxu1 }
 0x252   :  { %v4223_v38 = vadd.f32 %v5067_v32, %v1381_v33  ;;  %v1383_v43 = vpop.f32.mrb[1].mxu1 }
 0x253   :  { %v4225_v46 = vadd.f32 %v5069_v36, %v1383_v43 }
 0x254   :  { %v2881_v45 = vmul.f32 -1.442695, %v4223_v38 }
 0x255   :  { %v2882_v48 = vmul.f32 -1.442695, %v4225_v46 }
 0x256   :  { %4300 = vpow2.f32 %v2881_v45 }
 0x257   :  { %4302 = vpow2.f32 %v2882_v48 }
 0x260   :  { %v4301_v49 = vpop.eup %4300 }
 0x261   :  { %v1460_v51 = vadd.f32 1.0, %v4301_v49  ;;  %v4303_v55 = vpop.eup %4302 }
 0x262   :  { %v1467_v57 = vadd.f32 1.0, %v4303_v55 }
 0x263   :  { %4304 = vrcp.f32 %v1460_v51 }
 0x264   :  { %4306 = vrcp.f32 %v1467_v57 }
 0x26d   :  { %v4305_v60 = vpop.eup %4304 }
 0x26e   :  { %v1470_v2 = vmul.f32 %v4305_v60, %v1453_v58  ;;  %v4307_v8 = vpop.eup %4306 }
 0x26f   :  { %v1473_v13 = vsub.f32 1.0, %v4307_v8  ;;  %v1475_v18 = vmul.f32 0.0, %v4307_v8 }
 0x270   :  { %v1471_v3 = vadd.f32 %v1470_v2, %v1180_v1 }
 0x272   :  { %4308 = vtanh.f32 %v1471_v3 }
 0x27c   :  { %v4309_v14 = vpop.eup %4308 }
 0x27d   :  { %v1474_v7 = vmul.f32 %v4309_v14, %v1473_v13 }
 0x27f   :  { %v1476_v19 = vadd.f32 %v1475_v18, %v1474_v7 }
 0x281   :  { %1553 = vmatmul.mubr.f32.vlgmr.msra.gmra.mrb[2].mxu1 %v1476_v19  ;;  %3379 = vmatmul.mubr.f32.vlgmr.msra.gmra.mrb[10].mxu0 %v1476_v19 }
 0x282   :  { %3865 = vmatpush1.bf16.msra.mxu1 %v4912_v61  ;;  %3896 = vmatpush3.bf16.msra.mxu0 %v4736_v40 }
 0x283   :  { %3867 = vmatprep.subr.bf16.mxu1 %v4915_v63  ;;  %3897 = vmatprep.subr.bf16.mxu0 %v4332_v41 }
 0x284   :  { %1726 = vmatprep.mubr.f32.mxu1 %v4331_v37  ;;  %3413 = vmatprep.mubr.msk.f32.mxu0 %vm4333_vm4, %v4331_v37 }
 0x286   :  { %3869 = vmatpush1.bf16.msra.mxu1 %v4931_v4  ;;  %3899 = vmatpush3.bf16.msra.mxu0 %v4747_v44 }
 0x287   :  { %3871 = vmatprep.subr.bf16.mxu1 %v4934_v5  ;;  %3900 = vmatprep.subr.bf16.mxu0 %v4332_v41 }
 0x28a   :  { %3873 = vmatpush1.bf16.msra.mxu1 %v4949_v11  ;;  %3902 = vmatpush3.bf16.msra.mxu0 %v4757_v47 }
 0x28b   :  { %3875 = vmatprep.subr.bf16.mxu1 %v4952_v12  ;;  %3903 = vmatprep.subr.bf16.mxu0 %v4332_v41 }
 0x28e   :  { %3877 = vmatpush1.bf16.msra.mxu1 %v4967_v16  ;;  %3905 = vmatpush3.bf16.msra.mxu0 %v4768_v50 }
 0x28f   :  { %3879 = vmatprep.subr.bf16.mxu1 %v4970_v17  ;;  %3906 = vmatprep.subr.bf16.mxu0 %v4332_v41 }
 0x292   :  { %3881 = vmatpush1.bf16.msra.mxu1 %v4985_v22  ;;  %3908 = vmatpush3.bf16.msra.mxu0 %v4778_v53 }
 0x293   :  { %3883 = vmatprep.subr.bf16.mxu1 %v4989_v23  ;;  %3909 = vmatprep.subr.bf16.mxu0 %v4332_v41 }
 0x296   :  { %3885 = vmatpush1.bf16.msra.mxu1 %v5004_v28  ;;  %3911 = vmatpush3.bf16.msra.mxu0 %v4788_v56 }
 0x297   :  { %3887 = vmatprep.subr.bf16.mxu1 %v5007_v29  ;;  %3912 = vmatprep.subr.bf16.mxu0 %v4332_v41 }
 0x29a   :  { %3889 = vmatpush1.bf16.msra.mxu1 %v5022_v34  ;;  %3914 = vmatpush3.bf16.msra.mxu0 %v4798_v59 }
 0x29b   :  { %3891 = vmatprep.subr.bf16.mxu1 %v5025_v35  ;;  %3915 = vmatprep.subr.bf16.mxu0 %v4332_v41 }
 0x29e   :  { %3893 = vmatpush1.bf16.msra.mxu1 %v5034_v39  ;;  %3917 = vmatpush3.bf16.msra.mxu0 %v4808_v62 }
 0x29f   :  { %3919 = vmatprep.subr.bf16.mxu1 %v4897_v52  ;;  %3950 = vmatprep.subr.bf16.mxu0 %v4332_v41 }
 0x354   :  { %v1554_v42 = vpop.f32.mrb[2].mxu1  ;;  %v1625_v0 = vpop.f32.mrb[10].mxu0 }
 0x355   :  { %v4227_v6 = vadd.f32 %v5067_v32, %v1554_v42  ;;  %v1556_v10 = vpop.f32.mrb[3].mxu1  ;;  %v3380_v20 = vpop.f32.mrb[11].mxu0  ;;  %v1626_v33 = vadd.f32 %v1625_v0, %v5073_v54 }
 0x356   :  { %v4229_v24 = vadd.f32 %v5069_v36, %v1556_v10 }
 0x357   :  { %v2883_v21 = vmul.f32 -1.442695, %v4227_v6 }
 0x358   :  { %v2884_v25 = vmul.f32 -1.442695, %v4229_v24 }
 0x359   :  { %4310 = vpow2.f32 %v2883_v21 }
 0x35a   :  { %4312 = vpow2.f32 %v2884_v25 }
 0x363   :  { %v4311_v26 = vpop.eup %4310 }
 0x364   :  { %v1633_v27 = vadd.f32 1.0, %v4311_v26  ;;  %v4313_v30 = vpop.eup %4312 }
 0x365   :  { %v1640_v31 = vadd.f32 1.0, %v4313_v30 }
 0x366   :  { %4314 = vrcp.f32 %v1633_v27 }
 0x367   :  { %4316 = vrcp.f32 %v1640_v31 }
 0x370   :  { %v4315_v38 = vpop.eup %4314 }
 0x371   :  { %v1643_v43 = vmul.f32 %v4315_v38, %v1626_v33  ;;  %v4317_v46 = vpop.eup %4316 }
 0x372   :  { %v1646_v48 = vsub.f32 1.0, %v4317_v46  ;;  %v1648_v55 = vmul.f32 %v4317_v46, %v1476_v19 }
 0x373   :  { %v1644_v45 = vadd.f32 %v1643_v43, %v5060_v9 }
 0x375   :  { %4318 = vtanh.f32 %v1644_v45 }
 0x37f   :  { %v4319_v49 = vpop.eup %4318 }
 0x380   :  { %v1647_v51 = vmul.f32 %v4319_v49, %v1646_v48 }
 0x382   :  { %v1649_v57 = vadd.f32 %v1648_v55, %v1647_v51 }
 0x384   :  { %1727 = vmatmul.mubr.f32.vlgmr.msra.gmra.mrb[4].mxu1 %v1649_v57  ;;  %3414 = vmatmul.mubr.f32.vlgmr.msra.gmra.mrb[12].mxu0 %v1649_v57 }
 0x385   :  { %3921 = vmatpush1.bf16.msra.mxu1 %v4912_v61  ;;  %3952 = vmatpush3.bf16.msra.mxu0 %v4736_v40 }
 0x386   :  { %3923 = vmatprep.subr.bf16.mxu1 %v4915_v63  ;;  %3953 = vmatprep.subr.bf16.mxu0 %v4332_v41 }
 0x387   :  { %1900 = vmatprep.mubr.f32.mxu1 %v4331_v37  ;;  %3448 = vmatprep.mubr.msk.f32.mxu0 %vm4333_vm4, %v4331_v37 }
 0x389   :  { %3925 = vmatpush1.bf16.msra.mxu1 %v4931_v4  ;;  %3955 = vmatpush3.bf16.msra.mxu0 %v4747_v44 }
 0x38a   :  { %3927 = vmatprep.subr.bf16.mxu1 %v4934_v5  ;;  %3956 = vmatprep.subr.bf16.mxu0 %v4332_v41 }
 0x38d   :  { %3929 = vmatpush1.bf16.msra.mxu1 %v4949_v11  ;;  %3958 = vmatpush3.bf16.msra.mxu0 %v4757_v47 }
 0x38e   :  { %3931 = vmatprep.subr.bf16.mxu1 %v4952_v12  ;;  %3959 = vmatprep.subr.bf16.mxu0 %v4332_v41 }
 0x391   :  { %3933 = vmatpush1.bf16.msra.mxu1 %v4967_v16  ;;  %3961 = vmatpush3.bf16.msra.mxu0 %v4768_v50 }
 0x392   :  { %3935 = vmatprep.subr.bf16.mxu1 %v4970_v17  ;;  %3962 = vmatprep.subr.bf16.mxu0 %v4332_v41 }
 0x395   :  { %3937 = vmatpush1.bf16.msra.mxu1 %v4985_v22  ;;  %3964 = vmatpush3.bf16.msra.mxu0 %v4778_v53 }
 0x396   :  { %3939 = vmatprep.subr.bf16.mxu1 %v4989_v23  ;;  %3965 = vmatprep.subr.bf16.mxu0 %v4332_v41 }
 0x399   :  { %3941 = vmatpush1.bf16.msra.mxu1 %v5004_v28  ;;  %3967 = vmatpush3.bf16.msra.mxu0 %v4788_v56 }
 0x39a   :  { %3943 = vmatprep.subr.bf16.mxu1 %v5007_v29  ;;  %3968 = vmatprep.subr.bf16.mxu0 %v4332_v41 }
 0x39d   :  { %3945 = vmatpush1.bf16.msra.mxu1 %v5022_v34  ;;  %3970 = vmatpush3.bf16.msra.mxu0 %v4798_v59 }
 0x39e   :  { %3947 = vmatprep.subr.bf16.mxu1 %v5025_v35  ;;  %3971 = vmatprep.subr.bf16.mxu0 %v4332_v41 }
 0x3a1   :  { %3949 = vmatpush1.bf16.msra.mxu1 %v5034_v39  ;;  %3973 = vmatpush3.bf16.msra.mxu0 %v4808_v62 }
 0x3a2   :  { %3975 = vmatprep.subr.bf16.mxu1 %v4897_v52  ;;  %4006 = vmatprep.subr.bf16.mxu0 %v4332_v41 }
 0x457   :  { %v1728_v9 = vpop.f32.mrb[4].mxu1  ;;  %v1799_v58 = vpop.f32.mrb[12].mxu0 }
 0x458   :  { %v4231_v60 = vadd.f32 %v5067_v32, %v1728_v9  ;;  %v1730_v1 = vpop.f32.mrb[5].mxu1  ;;  %v3415_v2 = vpop.f32.mrb[13].mxu0  ;;  %v1800_v42 = vadd.f32 %v1799_v58, %v5073_v54 }
 0x459   :  { %v4233_v8 = vadd.f32 %v5069_v36, %v1730_v1 }
 0x45a   :  { %v2885_v3 = vmul.f32 -1.442695, %v4231_v60  ;;  %v2897_v60 = vld [vmem:[%s5377_s8] ss:$0 sm:$0xff] }
 0x45b   :  { %v2886_v13 = vmul.f32 -1.442695, %v4233_v8 }
 0x45c   :  { %4320 = vpow2.f32 %v2885_v3 }
 0x45d   :  { %4322 = vpow2.f32 %v2886_v13 }
 0x466   :  { %v4321_v14 = vpop.eup %4320 }
 0x467   :  { %v1807_v7 = vadd.f32 1.0, %v4321_v14  ;;  %v4323_v18 = vpop.eup %4322 }
 0x468   :  { %v1814_v19 = vadd.f32 1.0, %v4323_v18 }
 0x469   :  { %4324 = vrcp.f32 %v1807_v7 }
 0x46a   :  { %4326 = vrcp.f32 %v1814_v19 }
 0x473   :  { %v4325_v0 = vpop.eup %4324 }
 0x474   :  { %v1817_v6 = vmul.f32 %v4325_v0, %v1800_v42  ;;  %v4327_v10 = vpop.eup %4326 }
 0x475   :  { %v1820_v20 = vsub.f32 1.0, %v4327_v10  ;;  %v1822_v24 = vmul.f32 %v4327_v10, %v1649_v57 }
 0x476   :  { %v1818_v32 = vadd.f32 %v1817_v6, %v5062_v15 }
 0x478   :  { %4328 = vtanh.f32 %v1818_v32 }
 0x482   :  { %v4329_v21 = vpop.eup %4328 }
 0x483   :  { %v1821_v36 = vmul.f32 %v4329_v21, %v1820_v20 }
 0x485   :  { %v5154_v25 = vadd.f32 %v1822_v24, %v1821_v36 }
 0x487   :  { %1901 = vmatmul.mubr.f32.vlgmr.msra.gmra.mrb[24].mxu1 %v5154_v25  ;;  %3449 = vmatmul.mubr.f32.vlgmr.msra.gmra.mrb[14].mxu0 %v5154_v25 }
 0x488   :  { %3977 = vmatpush1.bf16.msra.mxu1 %v4912_v61  ;;  %4008 = vmatpush3.bf16.msra.mxu0 %v4736_v40 }
 0x489   :  { %3979 = vmatprep.subr.bf16.mxu1 %v4915_v63  ;;  %4009 = vmatprep.subr.bf16.mxu0 %v4332_v41 }
 0x48a   :  { %2074 = vmatprep.mubr.f32.mxu1 %v4331_v37  ;;  %3483 = vmatprep.mubr.msk.f32.mxu0 %vm4333_vm4, %v4331_v37 }
 0x48c   :  { %3981 = vmatpush1.bf16.msra.mxu1 %v4931_v4  ;;  %4011 = vmatpush3.bf16.msra.mxu0 %v4747_v44 }
 0x48d   :  { %3983 = vmatprep.subr.bf16.mxu1 %v4934_v5  ;;  %4012 = vmatprep.subr.bf16.mxu0 %v4332_v41 }
 0x490   :  { %3985 = vmatpush1.bf16.msra.mxu1 %v4949_v11  ;;  %4014 = vmatpush3.bf16.msra.mxu0 %v4757_v47 }
 0x491   :  { %3987 = vmatprep.subr.bf16.mxu1 %v4952_v12  ;;  %4015 = vmatprep.subr.bf16.mxu0 %v4332_v41 }
 0x494   :  { %3989 = vmatpush1.bf16.msra.mxu1 %v4967_v16  ;;  %4017 = vmatpush3.bf16.msra.mxu0 %v4768_v50 }
 0x495   :  { %3991 = vmatprep.subr.bf16.mxu1 %v4970_v17  ;;  %4018 = vmatprep.subr.bf16.mxu0 %v4332_v41 }
 0x498   :  { %3993 = vmatpush1.bf16.msra.mxu1 %v4985_v22  ;;  %4020 = vmatpush3.bf16.msra.mxu0 %v4778_v53 }
 0x499   :  { %3995 = vmatprep.subr.bf16.mxu1 %v4989_v23  ;;  %4021 = vmatprep.subr.bf16.mxu0 %v4332_v41 }
 0x49c   :  { %3997 = vmatpush1.bf16.msra.mxu1 %v5004_v28  ;;  %4023 = vmatpush3.bf16.msra.mxu0 %v4788_v56 }
 0x49d   :  { %3999 = vmatprep.subr.bf16.mxu1 %v5007_v29  ;;  %4024 = vmatprep.subr.bf16.mxu0 %v4332_v41 }
 0x4a0   :  { %4001 = vmatpush1.bf16.msra.mxu1 %v5022_v34  ;;  %4026 = vmatpush3.bf16.msra.mxu0 %v4798_v59 }
 0x4a1   :  { %4003 = vmatprep.subr.bf16.mxu1 %v5025_v35  ;;  %4027 = vmatprep.subr.bf16.mxu0 %v4332_v41 }
 0x4a4   :  { %4005 = vmatpush1.bf16.msra.mxu1 %v5034_v39  ;;  %4029 = vmatpush3.bf16.msra.mxu0 %v4808_v62 }
 0x4a5   :  { %4031 = vmatprep.subr.bf16.mxu1 %v4897_v52  ;;  %4062 = vmatprep.subr.bf16.mxu0 %v4332_v41 }
 0x4a7   :  { %2075 = vmatmul.mubr.f32.vlgmr.msra.gmra.mrb[26].mxu1 %v5154_v25  ;;  %3484 = vmatmul.mubr.f32.vlgmr.msra.gmra.mrb[16].mxu0 %v5154_v25 }
 0x4a8   :  { %4033 = vmatpush1.bf16.msra.mxu1 %v4912_v61  ;;  %4064 = vmatpush3.bf16.msra.mxu0 %v4736_v40 }
 0x4a9   :  { %4035 = vmatprep.subr.bf16.mxu1 %v4915_v63  ;;  %4065 = vmatprep.subr.bf16.mxu0 %v4332_v41 }
 0x4aa   :  { %2248 = vmatprep.mubr.f32.mxu1 %v4331_v37  ;;  %3518 = vmatprep.mubr.msk.f32.mxu0 %vm4333_vm4, %v4331_v37 }
 0x4ac   :  { %4037 = vmatpush1.bf16.msra.mxu1 %v4931_v4  ;;  %4067 = vmatpush3.bf16.msra.mxu0 %v4747_v44 }
 0x4ad   :  { %4039 = vmatprep.subr.bf16.mxu1 %v4934_v5  ;;  %4068 = vmatprep.subr.bf16.mxu0 %v4332_v41 }
 0x4b0   :  { %4041 = vmatpush1.bf16.msra.mxu1 %v4949_v11  ;;  %4070 = vmatpush3.bf16.msra.mxu0 %v4757_v47 }
 0x4b1   :  { %4043 = vmatprep.subr.bf16.mxu1 %v4952_v12  ;;  %4071 = vmatprep.subr.bf16.mxu0 %v4332_v41 }
 0x4b4   :  { %4045 = vmatpush1.bf16.msra.mxu1 %v4967_v16  ;;  %4073 = vmatpush3.bf16.msra.mxu0 %v4768_v50 }
 0x4b5   :  { %4047 = vmatprep.subr.bf16.mxu1 %v4970_v17  ;;  %4074 = vmatprep.subr.bf16.mxu0 %v4332_v41 }
 0x4b8   :  { %4049 = vmatpush1.bf16.msra.mxu1 %v4985_v22  ;;  %4076 = vmatpush3.bf16.msra.mxu0 %v4778_v53 }
 0x4b9   :  { %4051 = vmatprep.subr.bf16.mxu1 %v4989_v23  ;;  %4077 = vmatprep.subr.bf16.mxu0 %v4332_v41 }
 0x4bc   :  { %4053 = vmatpush1.bf16.msra.mxu1 %v5004_v28  ;;  %4079 = vmatpush3.bf16.msra.mxu0 %v4788_v56 }
 0x4bd   :  { %4055 = vmatprep.subr.bf16.mxu1 %v5007_v29  ;;  %4080 = vmatprep.subr.bf16.mxu0 %v4332_v41 }
 0x4c0   :  { %4057 = vmatpush1.bf16.msra.mxu1 %v5022_v34  ;;  %4082 = vmatpush3.bf16.msra.mxu0 %v4798_v59 }
 0x4c1   :  { %4059 = vmatprep.subr.bf16.mxu1 %v5025_v35  ;;  %4083 = vmatprep.subr.bf16.mxu0 %v4332_v41 }
 0x4c4   :  { %4061 = vmatpush1.bf16.msra.mxu1 %v5034_v39  ;;  %4085 = vmatpush3.bf16.msra.mxu0 %v4808_v62 }
 0x4c5   :  { %4087 = vmatprep.subr.bf16.mxu1 %v4897_v52  ;;  %4118 = vmatprep.subr.bf16.mxu0 %v4332_v41 }
 0x4c7   :  { %2249 = vmatmul.mubr.f32.vlgmr.msra.gmra.mrb[28].mxu1 %v5154_v25  ;;  %3519 = vmatmul.mubr.f32.vlgmr.msra.gmra.mrb[18].mxu0 %v5154_v25 }
 0x4c8   :  { %4089 = vmatpush1.bf16.msra.mxu1 %v4912_v61  ;;  %4120 = vmatpush3.bf16.msra.mxu0 %v4736_v40 }
 0x4c9   :  { %4091 = vmatprep.subr.bf16.mxu1 %v4915_v63  ;;  %4121 = vmatprep.subr.bf16.mxu0 %v4332_v41 }
 0x4ca   :  { %2422 = vmatprep.mubr.f32.mxu1 %v4331_v37  ;;  %3553 = vmatprep.mubr.msk.f32.mxu0 %vm4333_vm4, %v4331_v37 }
 0x4cc   :  { %4093 = vmatpush1.bf16.msra.mxu1 %v4931_v4  ;;  %4123 = vmatpush3.bf16.msra.mxu0 %v4747_v44 }
 0x4cd   :  { %4095 = vmatprep.subr.bf16.mxu1 %v4934_v5  ;;  %4124 = vmatprep.subr.bf16.mxu0 %v4332_v41 }
 0x4d0   :  { %4097 = vmatpush1.bf16.msra.mxu1 %v4949_v11  ;;  %4126 = vmatpush3.bf16.msra.mxu0 %v4757_v47 }
 0x4d1   :  { %4099 = vmatprep.subr.bf16.mxu1 %v4952_v12  ;;  %4127 = vmatprep.subr.bf16.mxu0 %v4332_v41 }
 0x4d4   :  { %4101 = vmatpush1.bf16.msra.mxu1 %v4967_v16  ;;  %4129 = vmatpush3.bf16.msra.mxu0 %v4768_v50 }
 0x4d5   :  { %4103 = vmatprep.subr.bf16.mxu1 %v4970_v17  ;;  %4130 = vmatprep.subr.bf16.mxu0 %v4332_v41 }
 0x4d8   :  { %4105 = vmatpush1.bf16.msra.mxu1 %v4985_v22  ;;  %4132 = vmatpush3.bf16.msra.mxu0 %v4778_v53 }
 0x4d9   :  { %4107 = vmatprep.subr.bf16.mxu1 %v4989_v23  ;;  %4133 = vmatprep.subr.bf16.mxu0 %v4332_v41 }
 0x4dc   :  { %4109 = vmatpush1.bf16.msra.mxu1 %v5004_v28  ;;  %4135 = vmatpush3.bf16.msra.mxu0 %v4788_v56 }
 0x4dd   :  { %4111 = vmatprep.subr.bf16.mxu1 %v5007_v29  ;;  %4136 = vmatprep.subr.bf16.mxu0 %v4332_v41 }
 0x4e0   :  { %4113 = vmatpush1.bf16.msra.mxu1 %v5022_v34  ;;  %4138 = vmatpush3.bf16.msra.mxu0 %v4798_v59 }
 0x4e1   :  { %4115 = vmatprep.subr.bf16.mxu1 %v5025_v35  ;;  %4139 = vmatprep.subr.bf16.mxu0 %v4332_v41 }
 0x4e4   :  { %4117 = vmatpush1.bf16.msra.mxu1 %v5034_v39  ;;  %4141 = vmatpush3.bf16.msra.mxu0 %v4808_v62 }
 0x4e5   :  { %4143 = vmatprep.subr.bf16.mxu1 %v4897_v52  ;;  %4174 = vmatprep.subr.bf16.mxu0 %v4332_v41 }
 0x4e7   :  { %2423 = vmatmul.mubr.f32.vlgmr.msra.gmra.mrb[30].mxu1 %v5154_v25  ;;  %3554 = vmatmul.mubr.f32.vlgmr.msra.gmra.mrb[20].mxu0 %v5154_v25 }
 0x4e8   :  { %4145 = vmatpush1.bf16.msra.mxu1 %v4912_v61  ;;  %4176 = vmatpush3.bf16.msra.mxu0 %v4736_v40  ;;  %v2701_v40 = vld [vmem:[%s5376_s7] sm:$0xff]  ;;  %v2707_v61 = vld [vmem:[%s5376_s7 + $0x30] sm:$0xff] }
 0x4e9   :  { %4147 = vmatprep.subr.bf16.mxu1 %v4915_v63  ;;  %4177 = vmatprep.subr.bf16.mxu0 %v4332_v41 }
 0x4ea   :  { %2596 = vmatprep.mubr.f32.mxu1 %v4331_v37  ;;  %3588 = vmatprep.mubr.msk.f32.mxu0 %vm4333_vm4, %v4331_v37 }
 0x4ec   :  { %4149 = vmatpush1.bf16.msra.mxu1 %v4931_v4  ;;  %4179 = vmatpush3.bf16.msra.mxu0 %v4747_v44  ;;  %v2702_v44 = vld [vmem:[%s5376_s7 + $0x8] sm:$0xff]  ;;  %v2709_v4 = vld [vmem:[%s5376_s7 + $0x40] sm:$0xff] }
 0x4ed   :  { %4151 = vmatprep.subr.bf16.mxu1 %v4934_v5  ;;  %4180 = vmatprep.subr.bf16.mxu0 %v4332_v41  ;;  %v2710_v5 = vld [vmem:[%s5376_s7 + $0x48] sm:$0xff] }
 0x4f0   :  { %4153 = vmatpush1.bf16.msra.mxu1 %v4949_v11  ;;  %4182 = vmatpush3.bf16.msra.mxu0 %v4757_v47  ;;  %v4199_v47 = vpack.c.bf16 %v2702_v44, %v2701_v40  ;;  %v4211_v11 = vpack.c.bf16 %v2710_v5, %v2709_v4 }
 0x4f1   :  { %4155 = vmatprep.subr.bf16.mxu1 %v4952_v12  ;;  %4183 = vmatprep.subr.bf16.mxu0 %v4332_v41  ;;  %v2711_v12 = vld [vmem:[%s5376_s7 + $0x50] sm:$0xff] }
 0x4f4   :  { %4157 = vmatpush1.bf16.msra.mxu1 %v4967_v16  ;;  %4185 = vmatpush3.bf16.msra.mxu0 %v4768_v50  ;;  %v2703_v50 = vld [vmem:[%s5376_s7 + $0x10] sm:$0xff]  ;;  %v2712_v16 = vld [vmem:[%s5376_s7 + $0x58] sm:$0xff] }
 0x4f5   :  { %4159 = vmatprep.subr.bf16.mxu1 %v4970_v17  ;;  %4186 = vmatprep.subr.bf16.mxu0 %v4332_v41  ;;  %v4214_v17 = vpack.c.bf16 %v2712_v16, %v2711_v12 }
 0x4f8   :  { %4161 = vmatpush1.bf16.msra.mxu1 %v4985_v22  ;;  %4188 = vmatpush3.bf16.msra.mxu0 %v4778_v53  ;;  %v2704_v53 = vld [vmem:[%s5376_s7 + $0x18] sm:$0xff]  ;;  %v2713_v22 = vld [vmem:[%s5376_s7 + $0x60] sm:$0xff] }
 0x4f9   :  { %4163 = vmatprep.subr.bf16.mxu1 %v4989_v23  ;;  %4189 = vmatprep.subr.bf16.mxu0 %v4332_v41  ;;  %v2714_v23 = vld [vmem:[%s5376_s7 + $0x68] sm:$0xff] }
 0x4fc   :  { %4165 = vmatpush1.bf16.msra.mxu1 %v5004_v28  ;;  %4191 = vmatpush3.bf16.msra.mxu0 %v4788_v56  ;;  %v4202_v56 = vpack.c.bf16 %v2704_v53, %v2703_v50  ;;  %v4217_v28 = vpack.c.bf16 %v2714_v23, %v2713_v22 }
 0x4fd   :  { %4167 = vmatprep.subr.bf16.mxu1 %v5007_v29  ;;  %4192 = vmatprep.subr.bf16.mxu0 %v4332_v41  ;;  %v2715_v29 = vld [vmem:[%s5376_s7 + $0x70] sm:$0xff] }
 0x500   :  { %4169 = vmatpush1.bf16.msra.mxu1 %v5022_v34  ;;  %4194 = vmatpush3.bf16.msra.mxu0 %v4798_v59  ;;  %v2705_v59 = vld [vmem:[%s5376_s7 + $0x20] sm:$0xff]  ;;  %v2716_v34 = vld [vmem:[%s5376_s7 + $0x78] sm:$0xff] }
 0x501   :  { %4171 = vmatprep.subr.bf16.mxu1 %v5025_v35  ;;  %4195 = vmatprep.subr.bf16.mxu0 %v4332_v41  ;;  %v4220_v35 = vpack.c.bf16 %v2716_v34, %v2715_v29 }
 0x504   :  { %4173 = vmatpush1.bf16.msra.mxu1 %v5034_v39  ;;  %4197 = vmatpush3.bf16.msra.mxu0 %v4808_v62  ;;  %v2706_v62 = vld [vmem:[%s5376_s7 + $0x28] sm:$0xff] }
 0x505   :  { %4198 = vmatprep.subr.bf16.mxu1 %v4332_v41  ;;  %v4205_v52 = vpack.c.bf16 %v2706_v62, %v2705_v59 }
 0x507   :  { %2597 = vmatmul.mubr.f32.vlgmr.msra.gmra.mrb[32].mxu1 %v5154_v25  ;;  %3589 = vmatmul.mubr.f32.vlgmr.msra.gmra.mrb[22].mxu0 %v5154_v25 }
 0x508   :  { %4200 = vmatpush3.bf16.msra.mxu1 %v4199_v47  ;;  %3623 = vmatprep.mubr.msk.f32.mxu1 %vm4333_vm4, %v4331_v37  ;;  %v2708_v37 = vld [vmem:[%s5376_s7 + $0x38] sm:$0xff] }
 0x509   :  { %4201 = vmatprep.subr.bf16.mxu1 %v4332_v41  ;;  %v4208_v63 = vpack.c.bf16 %v2708_v37, %v2707_v61 }
 0x50c   :  { %4203 = vmatpush3.bf16.msra.mxu1 %v4202_v56 }
 0x50d   :  { %4204 = vmatprep.subr.bf16.mxu1 %v4332_v41 }
 0x510   :  { %4206 = vmatpush3.bf16.msra.mxu1 %v4205_v52 }
 0x511   :  { %4207 = vmatprep.subr.bf16.mxu1 %v4332_v41 }
 0x514   :  { %4209 = vmatpush3.bf16.msra.mxu1 %v4208_v63 }
 0x515   :  { %4210 = vmatprep.subr.bf16.mxu1 %v4332_v41 }
 0x518   :  { %4212 = vmatpush3.bf16.msra.mxu1 %v4211_v11 }
 0x519   :  { %4213 = vmatprep.subr.bf16.mxu1 %v4332_v41 }
 0x51c   :  { %4215 = vmatpush3.bf16.msra.mxu1 %v4214_v17 }
 0x51d   :  { %4216 = vmatprep.subr.bf16.mxu1 %v4332_v41 }
 0x520   :  { %4218 = vmatpush3.bf16.msra.mxu1 %v4217_v28 }
 0x521   :  { %4219 = vmatprep.subr.bf16.mxu1 %v4332_v41 }
 0x524   :  { %4221 = vmatpush3.bf16.msra.mxu1 %v4220_v35 }
 0x527   :  { %3624 = vmatmul.mubr.f32.vlgmr.msra.gmra.mrb[34].mxu1 %v5154_v25 }
 0x55a   :  { %v1902_v39 = vpop.f32.mrb[24].mxu1  ;;  %v1973_v15 = vpop.f32.mrb[14].mxu0 }
 0x55b   :  { %v1904_v54 = vpop.f32.mrb[25].mxu1  ;;  %v3450_v26 = vpop.f32.mrb[15].mxu0 }
 0x57a   :  { %v2076_v27 = vpop.f32.mrb[26].mxu1  ;;  %v2147_v30 = vpop.f32.mrb[16].mxu0 }
 0x57b   :  { %v2078_v31 = vpop.f32.mrb[27].mxu1  ;;  %v3485_v33 = vpop.f32.mrb[17].mxu0 }
 0x59a   :  { %v2250_v38 = vpop.f32.mrb[28].mxu1  ;;  %v2321_v43 = vpop.f32.mrb[18].mxu0 }
 0x59b   :  { %v2252_v45 = vpop.f32.mrb[29].mxu1  ;;  %v3520_v46 = vpop.f32.mrb[19].mxu0 }
 0x5ba   :  { %v2424_v48 = vpop.f32.mrb[30].mxu1  ;;  %v2495_v49 = vpop.f32.mrb[20].mxu0 }
 0x5bb   :  { %v2426_v51 = vpop.f32.mrb[31].mxu1  ;;  %v3555_v55 = vpop.f32.mrb[21].mxu0 }
 0x5da   :  { %v2598_v41 = vpop.f32.mrb[32].mxu1  ;;  %v2669_v57 = vpop.f32.mrb[22].mxu0 }
 0x5db   :  { %v2600_v9 = vpop.f32.mrb[33].mxu1  ;;  %v3590_v58 = vpop.f32.mrb[23].mxu0 }
 0x5fa   :  { %v2790_v1 = vpop.f32.mrb[34].mxu1 }
 0x5fb   :  { %v2791_v2 = vadd.f32 %v2897_v60, %v2790_v1  ;;  %v3625_v3 = vpop.f32.mrb[35].mxu1 }
 0x5fd   :  { %2794 = vst [vmem:[%s5378_s9] sm:$0xff] %v2791_v2 }

</bundles_post_ra>
